<compile_context>
chip_gen: v7x
topology: tpu7x:2x2x1
jax: 0.10.0
libtpu: 0.0.40
codegen_flags: <defaults>
</compile_context>

<pallas_src>
import functools

import jax
import jax.numpy as jnp
from jax import lax
from jax.experimental import pallas as pl
from jax.experimental.pallas import tpu as pltpu


def _round_up(x, m):
    return (x + m - 1) // m * m


# ---------------------------------------------------------------------------
# Phase 1: x-path projection for ALL timesteps (one big batched GEMM).
#   [gi_r(+b_hr) | gi_z(+b_hz) | gi_n | post_x] = X @ [W_ih | Wq_x] + bx
# ---------------------------------------------------------------------------
def xproj_kernel(x_ref, wx_ref, bx_ref, xg_ref, px_ref):
    g = xg_ref.shape[-1]                                       # 3*Hp
    acc = jnp.dot(x_ref[...].astype(wx_ref.dtype), wx_ref[...],
                  preferred_element_type=jnp.float32) + bx_ref[...]
    xg_ref[...] = acc[:, :g]                                   # gate pre-acts
    px_ref[...] = acc[:, g:]                                   # x-part of posterior


# ---------------------------------------------------------------------------
# Phase 2: the recurrence.  Only h @ Whh remains on the serial chain.
# grid = (batch_tiles, time_chunks); the hidden state is carried in a VMEM
# scratch across the (sequential, innermost) time-chunk axis.
# ---------------------------------------------------------------------------
def rssm_recurrent_kernel(xg_ref, h0_ref, whh_ref, bhn_ref, hid_ref, h_scr):
    Hp = h_scr.shape[-1]
    Tc, TB = xg_ref.shape[0], xg_ref.shape[1]

    # Seed the hidden-state carry at the first time chunk of this batch tile.
    @pl.when(pl.program_id(1) == 0)
    def _():
        h_scr[...] = h0_ref[...].astype(jnp.float32)

    wdt = whh_ref.dtype                                        # bf16 (perf) or f32
    whh = whh_ref[...]                                         # resident weights
    bhn = jnp.broadcast_to(bhn_ref[...], (TB, Hp))             # hoisted broadcast

    def step(t, h):
        xg = xg_ref[t]                                         # (TB, 3Hp) f32
        hg = jnp.dot(h.astype(wdt), whh,
                     preferred_element_type=jnp.float32)       # 1 MXU issue/step
        # PyTorch GRUCell gate order (r, z, n); slices are 128-lane aligned.
        r = jax.nn.sigmoid(xg[:, 0:Hp] + hg[:, 0:Hp])
        z = jax.nn.sigmoid(xg[:, Hp:2 * Hp] + hg[:, Hp:2 * Hp])
        n = jnp.tanh(xg[:, 2 * Hp:3 * Hp] + r * (hg[:, 2 * Hp:3 * Hp] + bhn))
        h_new = (1.0 - z) * n + z * h
        hid_ref[t] = h_new.astype(hid_ref.dtype)
        return h_new

    h_scr[...] = lax.fori_loop(0, Tc, step, h_scr[...], unroll=True)


# ---------------------------------------------------------------------------
# Phase 3: prior/posterior projection for ALL timesteps (one big GEMM).
#   [prior | post_h] = Hid @ [W_prior | Wq_h] + [b_prior | 0];  post += post_x
# ---------------------------------------------------------------------------
def hproj_kernel(h_ref, px_ref, wh2_ref, bp2_ref, prior_ref, post_ref):
    Lp = prior_ref.shape[-1]
    acc = jnp.dot(h_ref[...].astype(wh2_ref.dtype), wh2_ref[...],
                  preferred_element_type=jnp.float32) + bp2_ref[...]
    prior_ref[...] = acc[:, :Lp].astype(prior_ref.dtype)
    post_ref[...] = (acc[:, Lp:] + px_ref[...]).astype(post_ref.dtype)


# ---------------------------------------------------------------------------
# One-time weight re-layout (lane-aligned, merged, optionally bf16).
# ---------------------------------------------------------------------------
def prepare_params(params, latent_dim, hidden_dim, weight_dtype=jnp.bfloat16):
    H, L = hidden_dim, latent_dim
    Hp, Lp = _round_up(H, 128), _round_up(L, 128)

    def pad2(a, rows, cols):
        return jnp.pad(a, ((0, rows - a.shape[0]), (0, cols - a.shape[1])))

    def gate_pad_T(w, in_pad):
        # w: (3H, in_dim) -> (in_pad, 3Hp), each gate padded to Hp, transposed.
        return jnp.concatenate(
            [pad2(w[g * H:(g + 1) * H, :].T, in_pad, Hp) for g in range(3)],
            axis=1)

    w_ih, w_hh, w_post = params["w_ih"], params["w_hh"], params["w_post"]

    wih_p = gate_pad_T(w_ih, Lp)                               # (Lp, 3Hp)
    wqx_p = pad2(w_post[:, H:].T, Lp, Lp)                      # (Lp, Lp)
    whh_p = gate_pad_T(w_hh, Hp)                               # (Hp, 3Hp)
    wp_p = pad2(params["w_prior"].T, Hp, Lp)                   # (Hp, Lp)
    wqh_p = pad2(w_post[:, :H].T, Hp, Lp)                      # (Hp, Lp)

    wx = jnp.concatenate([wih_p, wqx_p], axis=1).astype(weight_dtype)   # (Lp, 3Hp+Lp)
    whh = whh_p.astype(weight_dtype)                                    # (Hp, 3Hp)
    wh2 = jnp.concatenate([wp_p, wqh_p], axis=1).astype(weight_dtype)   # (Hp, 2Lp)

    b_ih, b_hh = params["b_ih"], params["b_hh"]
    # Fold the r/z hidden biases into the x-path bias (phase 1); only the
    # n-gate hidden bias must stay inside the recurrent tanh (r * (... + b_hn)).
    bg = jnp.concatenate([
        jnp.pad(b_ih[0:H] + b_hh[0:H], (0, Hp - H)),
        jnp.pad(b_ih[H:2 * H] + b_hh[H:2 * H], (0, Hp - H)),
        jnp.pad(b_ih[2 * H:3 * H], (0, Hp - H)),
    ])
    bx = jnp.concatenate(
        [bg, jnp.pad(params["b_post"], (0, Lp - L))])[None, :].astype(jnp.float32)
    bhn = jnp.pad(b_hh[2 * H:3 * H], (0, Hp - H))[None, :].astype(jnp.float32)
    bp2 = jnp.concatenate(
        [jnp.pad(params["b_prior"], (0, Lp - L)),
         jnp.zeros((Lp,), jnp.float32)])[None, :].astype(jnp.float32)

    return dict(wx=wx, whh=whh, wh2=wh2, bx=bx, bhn=bhn, bp2=bp2)


# ---------------------------------------------------------------------------
# Fused sequence forward: obs_seq (T, B, L), prev_state (B, H).
# ---------------------------------------------------------------------------
@functools.partial(jax.jit,
                   static_argnames=("batch_tile", "time_chunk", "out_dtype"))
def rssm_sequence(prev_state, obs_seq, prep, *, batch_tile=None,
                  time_chunk=8, out_dtype=None):
    T, B, L = obs_seq.shape
    H = prev_state.shape[1]
    Hp, G = prep["whh"].shape                     # Hp, 3Hp  (static shapes)
    Lp = prep["wx"].shape[0]
    NX = prep["wx"].shape[1]                      # 3Hp + Lp
    N2 = prep["wh2"].shape[1]                     # 2Lp
    odt = out_dtype if out_dtype is not None else prev_state.dtype

    # ---- tiling ------------------------------------------------------------
    if batch_tile is None:
        TB = min(128, _round_up(B, 8))            # v5e MXU is 128-wide
        if _round_up(B, TB) // TB < 2 and TB >= 16:
            TB = _round_up(TB // 2, 8)            # >=2 batch tiles for v7x cores
    else:
        TB = _round_up(batch_tile, 8)
    Bp = _round_up(B, TB)
    nb = Bp // TB

    Tc = max(1, min(time_chunk, T))               # timesteps per grid step
    Tp = _round_up(T, Tc)
    ntc = Tp // Tc

    M = Tp * Bp                                   # rows of the hoisted GEMMs
    MT = next(m for m in (1024, 512, 256, 128, 64, 32, 16, 8) if M % m == 0)

    vmem = 64 * 1024 * 1024

    # Lane/sublane-aligned padded layout (kept padded across all 3 phases;
    # only the final user-facing slice un-pads).
    x_p = jnp.zeros((Tp, Bp, Lp), jnp.float32).at[:T, :B, :L].set(
        obs_seq.astype(jnp.float32))
    h0_p = jnp.zeros((Bp, Hp), jnp.float32).at[:B, :H].set(
        prev_state.astype(jnp.float32))

    # ---- phase 1: hoisted x-path GEMM over all timesteps --------------------
    xg_flat, px_flat = pl.pallas_call(
        xproj_kernel,
        out_shape=(jax.ShapeDtypeStruct((M, G), jnp.float32),
                   jax.ShapeDtypeStruct((M, Lp), jnp.float32)),
        grid_spec=pltpu.PrefetchScalarGridSpec(
            num_scalar_prefetch=0,
            grid=(M // MT,),
            in_specs=[
                pl.BlockSpec((MT, Lp), lambda i: (i, 0)),      # X
                pl.BlockSpec((Lp, NX), lambda i: (0, 0)),      # [W_ih | Wq_x]
                pl.BlockSpec((1, NX), lambda i: (0, 0)),       # bx
            ],
            out_specs=(
                pl.BlockSpec((MT, G), lambda i: (i, 0)),       # gate pre-acts
                pl.BlockSpec((MT, Lp), lambda i: (i, 0)),      # posterior x-part
            ),
        ),
        compiler_params=pltpu.CompilerParams(
            dimension_semantics=("parallel",), vmem_limit_bytes=vmem),
    )(x_p.reshape(M, Lp), prep["wx"], prep["bx"])

    # ---- phase 2: serial GRU recurrence (time chunked, h in VMEM scratch) ---
    hidden_p = pl.pallas_call(
        rssm_recurrent_kernel,
        out_shape=jax.ShapeDtypeStruct((Tp, Bp, Hp), odt),
        grid_spec=pltpu.PrefetchScalarGridSpec(
            num_scalar_prefetch=0,
            grid=(nb, ntc),     # time axis MUST stay last + sequential (carry)
            in_specs=[
                pl.BlockSpec((Tc, TB, G), lambda b, t: (t, b, 0)),   # xg chunk
                pl.BlockSpec((TB, Hp), lambda b, t: (b, 0)),         # h0
                pl.BlockSpec((Hp, G), lambda b, t: (0, 0)),          # Whh (resident)
                pl.BlockSpec((1, Hp), lambda b, t: (0, 0)),          # b_hn
            ],
            out_specs=pl.BlockSpec((Tc, TB, Hp), lambda b, t: (t, b, 0)),
            scratch_shapes=[pltpu.VMEM((TB, Hp), jnp.float32)],
        ),
        compiler_params=pltpu.CompilerParams(
            dimension_semantics=("parallel", "arbitrary"),
            vmem_limit_bytes=vmem),
    )(xg_flat.reshape(Tp, Bp, G), h0_p, prep["whh"], prep["bhn"])

    # ---- phase 3: hoisted prior/posterior GEMM over all timesteps -----------
    prior_flat, post_flat = pl.pallas_call(
        hproj_kernel,
        out_shape=(jax.ShapeDtypeStruct((M, Lp), odt),
                   jax.ShapeDtypeStruct((M, Lp), odt)),
        grid_spec=pltpu.PrefetchScalarGridSpec(
            num_scalar_prefetch=0,
            grid=(M // MT,),
            in_specs=[
                pl.BlockSpec((MT, Hp), lambda i: (i, 0)),      # hidden
                pl.BlockSpec((MT, Lp), lambda i: (i, 0)),      # posterior x-part
                pl.BlockSpec((Hp, N2), lambda i: (0, 0)),      # [W_prior | Wq_h]
                pl.BlockSpec((1, N2), lambda i: (0, 0)),       # [b_prior | 0]
            ],
            out_specs=(
                pl.BlockSpec((MT, Lp), lambda i: (i, 0)),
                pl.BlockSpec((MT, Lp), lambda i: (i, 0)),
            ),
        ),
        compiler_params=pltpu.CompilerParams(
            dimension_semantics=("parallel",), vmem_limit_bytes=vmem),
    )(hidden_p.reshape(M, Hp), px_flat, prep["wh2"], prep["bp2"])

    hidden = hidden_p[:T, :B, :H]
    prior = prior_flat.reshape(Tp, Bp, Lp)[:T, :B, :L]
    post = post_flat.reshape(Tp, Bp, Lp)[:T, :B, :L]
    return hidden, prior, post


def rssm_forward(prev_state, embedded_obs, prep):
    """Single-step RSSM.forward(prev_state, embedded_obs) == T=1 sequence."""
    # TODO(synk): embedded_obs=None branch (posterior = prior) is not
    # implemented; the reference nn.GRUCell would itself fail on a None input.
    h, p, q = rssm_sequence(prev_state, embedded_obs[None], prep)
    return h[0], p[0], q[0]


# ---------------------------------------------------------------------------
# Parameter init + pure-JAX reference (nn.GRUCell + Linear semantics).
# ---------------------------------------------------------------------------
def init_params(key, latent_dim, hidden_dim):
    ks = jax.random.split(key, 8)
    s_gru = 1.0 / jnp.sqrt(hidden_dim)
    s_pri = 1.0 / jnp.sqrt(hidden_dim)
    s_pos = 1.0 / jnp.sqrt(hidden_dim + latent_dim)
    u = lambda k, shape, s: jax.random.uniform(k, shape, jnp.float32, -s, s)
    return {
        "w_ih": u(ks[0], (3 * hidden_dim, latent_dim), s_gru),
        "w_hh": u(ks[1], (3 * hidden_dim, hidden_dim), s_gru),
        "b_ih": u(ks[2], (3 * hidden_dim,), s_gru),
        "b_hh": u(ks[3], (3 * hidden_dim,), s_gru),
        "w_prior": u(ks[4], (latent_dim, hidden_dim), s_pri),
        "b_prior": u(ks[5], (latent_dim,), s_pri),
        "w_post": u(ks[6], (latent_dim, hidden_dim + latent_dim), s_pos),
        "b_post": u(ks[7], (latent_dim,), s_pos),
    }


def rssm_reference(prev_state, embedded_obs, p):
    hi = jax.lax.Precision.HIGHEST
    x, h = embedded_obs, prev_state
    H = h.shape[1]
    gi = jnp.dot(x, p["w_ih"].T, precision=hi) + p["b_ih"]
    gh = jnp.dot(h, p["w_hh"].T, precision=hi) + p["b_hh"]
    r = jax.nn.sigmoid(gi[:, :H] + gh[:, :H])
    z = jax.nn.sigmoid(gi[:, H:2 * H] + gh[:, H:2 * H])
    n = jnp.tanh(gi[:, 2 * H:] + r * gh[:, 2 * H:])
    h_new = (1 - z) * n + z * h
    prior = jnp.dot(h_new, p["w_prior"].T, precision=hi) + p["b_prior"]
    post = jnp.dot(jnp.concatenate([h_new, x], axis=-1), p["w_post"].T,
                   precision=hi) + p["b_post"]
    return h_new, prior, post


if __name__ == "__main__":
    B, latent_dim, hidden_dim, T = 2, 32, 32, 8

    key = jax.random.PRNGKey(0)
    k_p, k_h, k_x = jax.random.split(key, 3)
    params = init_params(k_p, latent_dim, hidden_dim)
    prev_state = jax.random.normal(k_h, (B, hidden_dim), jnp.float32)
    obs_seq = jax.random.normal(k_x, (T, B, latent_dim), jnp.float32)

    # Pure-JAX reference unrolled over T steps.
    ref_h, ref_p, ref_q = [], [], []
    h = prev_state
    for t in range(T):
        h, p_, q_ = rssm_reference(h, obs_seq[t], params)
        ref_h.append(h)
        ref_p.append(p_)
        ref_q.append(q_)
    ref_h, ref_p, ref_q = map(jnp.stack, (ref_h, ref_p, ref_q))

    # f32 weights: reference-semantics check.
    prep32 = prepare_params(params, latent_dim, hidden_dim,
                            weight_dtype=jnp.float32)
    h32, p32, q32 = rssm_sequence(prev_state, obs_seq, prep32)
    jax.block_until_ready((h32, p32, q32))
    assert jnp.allclose(h32, ref_h, atol=2e-2, rtol=2e-2), "hidden mismatch (f32)"
    assert jnp.allclose(p32, ref_p, atol=2e-2, rtol=2e-2), "prior mismatch (f32)"
    assert jnp.allclose(q32, ref_q, atol=2e-2, rtol=2e-2), "posterior mismatch (f32)"

    # bf16 weights: performance path (MXU-native inputs, f32 accumulation,
    # f32 hidden-state carry). Rounding drift compounds with T (documented).
    prep16 = prepare_params(params, latent_dim, hidden_dim,
                            weight_dtype=jnp.bfloat16)
    h16, p16, q16 = rssm_sequence(prev_state, obs_seq, prep16)
    jax.block_until_ready((h16, p16, q16))
    assert jnp.allclose(h16, ref_h, atol=6e-2, rtol=6e-2), "hidden mismatch (bf16)"
    assert jnp.allclose(p16, ref_p, atol=6e-2, rtol=6e-2), "prior mismatch (bf16)"
    assert jnp.allclose(q16, ref_q, atol=6e-2, rtol=6e-2), "posterior mismatch (bf16)"

    # Single-step API matching RSSM.forward(prev_state, embedded_obs).
    h1, p1, q1 = rssm_forward(prev_state, obs_seq[0], prep32)
    jax.block_until_ready((h1, p1, q1))
    assert jnp.allclose(h1, ref_h[0], atol=2e-2, rtol=2e-2), "step hidden mismatch"
    assert jnp.allclose(p1, ref_p[0], atol=2e-2, rtol=2e-2), "step prior mismatch"
    assert jnp.allclose(q1, ref_q[0], atol=2e-2, rtol=2e-2), "step posterior mismatch"

    print("KERNEL_OK")
</pallas_src>

<mosaic_0001>
module attributes {stable_mosaic.version = 11 : i64} {
  func.func @rssm_recurrent_kernel(%arg0: i32, %arg1: i32, %arg2: memref<8x8x384xf32, #tpu.memory_space<vmem>>, %arg3: memref<8x128xf32, #tpu.memory_space<vmem>>, %arg4: memref<128x384xf32, #tpu.memory_space<vmem>>, %arg5: memref<1x128xf32, #tpu.memory_space<vmem>>, %arg6: memref<8x8x128xf32, #tpu.memory_space<vmem>>, %arg7: memref<8x128xf32, #tpu.memory_space<vmem>>) attributes {dimension_semantics = [#tpu.dimension_semantics<parallel>, #tpu.dimension_semantics<arbitrary>], iteration_bounds = array<i64: 1, 1>, scalar_prefetch = 0 : i64, scratch_operands = 1 : i64, tpu.core_type = #tpu.core_type<tc>, window_params = [{transform_indices = @transform_0, window_bounds = array<i64: 8, 8, 384>}, {transform_indices = @transform_1, window_bounds = array<i64: 8, 128>}, {pipeline_mode = #tpu.pipeline_mode<synchronous>, transform_indices = @transform_2, window_bounds = array<i64: 128, 384>}, {pipeline_mode = #tpu.pipeline_mode<synchronous>, transform_indices = @transform_3, window_bounds = array<i64: 1, 128>}, {transform_indices = @transform_4, window_bounds = array<i64: 8, 8, 128>}]} {
    %c0_i32 = arith.constant 0 : i32
    %0 = arith.cmpi eq, %arg1, %c0_i32 : i32
    %1 = arith.extui %0 : i1 to i32
    %c0_i32_0 = arith.constant 0 : i32
    %2 = arith.cmpi ne, %1, %c0_i32_0 : i32
    scf.if %2 {
      %c0_72 = arith.constant 0 : index
      %c0_73 = arith.constant 0 : index
      %289 = vector.load %arg3[%c0_72, %c0_73] : memref<8x128xf32, #tpu.memory_space<vmem>>, vector<8x128xf32>
      %c0_74 = arith.constant 0 : index
      %c0_75 = arith.constant 0 : index
      %290 = vector.load %arg7[%c0_74, %c0_75] : memref<8x128xf32, #tpu.memory_space<vmem>>, vector<8x128xf32>
      tpu.vector_store %arg7[%c0_74, %c0_75], %289 {strides = array<i32>} : memref<8x128xf32, #tpu.memory_space<vmem>>, vector<8x128xf32>,
    } else {
    }
    %c0 = arith.constant 0 : index
    %c0_1 = arith.constant 0 : index
    %3 = vector.load %arg4[%c0, %c0_1] : memref<128x384xf32, #tpu.memory_space<vmem>>, vector<128x384xf32>
    %c0_2 = arith.constant 0 : index
    %c0_3 = arith.constant 0 : index
    %4 = vector.load %arg5[%c0_2, %c0_3] : memref<1x128xf32, #tpu.memory_space<vmem>>, vector<1x128xf32>
    %5 = vector.shape_cast %4 : vector<1x128xf32> to vector<1x128xf32>
    %6 = vector.broadcast %5 : vector<1x128xf32> to vector<8x128xf32>
    %c0_4 = arith.constant 0 : index
    %c0_5 = arith.constant 0 : index
    %7 = vector.load %arg7[%c0_4, %c0_5] : memref<8x128xf32, #tpu.memory_space<vmem>>, vector<8x128xf32>
    %c0_i32_6 = arith.constant 0 : i32
    %8 = arith.index_cast %c0_i32_6 : i32 to index
    %c0_7 = arith.constant 0 : index
    %c0_8 = arith.constant 0 : index
    %9 = vector.load %arg2[%8, %c0_7, %c0_8] : memref<8x8x384xf32, #tpu.memory_space<vmem>>, vector<1x8x384xf32>
    %10 = vector.shape_cast %9 : vector<1x8x384xf32> to vector<8x384xf32>
    %cst = arith.constant dense<0.000000e+00> : vector<8x384xf32>
    %11 = tpu.matmul %7, %3, %cst {dimension_numbers = #tpu.dot_dimension_numbers<[1], [0], [0], [1], [0, 0, 1, 1], [], []>} : vector<8x128xf32>, vector<128x384xf32>, vector<8x384xf32> -> vector<8x384xf32>
    %12 = vector.extract_strided_slice %10 {offsets = [0, 0], sizes = [8, 128], strides = [1, 1]} : vector<8x384xf32> to vector<8x128xf32>
    %13 = vector.extract_strided_slice %11 {offsets = [0, 0], sizes = [8, 128], strides = [1, 1]} : vector<8x384xf32> to vector<8x128xf32>
    %14 = arith.addf %12, %13 : vector<8x128xf32>
    %15 = arith.negf %14 : vector<8x128xf32>
    %16 = math.exp %15 : vector<8x128xf32>
    %cst_9 = arith.constant 1.000000e+00 : f32
    %17 = vector.broadcast %cst_9 : f32 to vector<8x128xf32>
    %18 = arith.addf %17, %16 : vector<8x128xf32>
    %19 = arith.divf %17, %18 : vector<8x128xf32>
    %20 = vector.extract_strided_slice %10 {offsets = [0, 128], sizes = [8, 128], strides = [1, 1]} : vector<8x384xf32> to vector<8x128xf32>
    %21 = vector.extract_strided_slice %11 {offsets = [0, 128], sizes = [8, 128], strides = [1, 1]} : vector<8x384xf32> to vector<8x128xf32>
    %22 = arith.addf %20, %21 : vector<8x128xf32>
    %23 = arith.negf %22 : vector<8x128xf32>
    %24 = math.exp %23 : vector<8x128xf32>
    %cst_10 = arith.constant 1.000000e+00 : f32
    %25 = vector.broadcast %cst_10 : f32 to vector<8x128xf32>
    %26 = arith.addf %25, %24 : vector<8x128xf32>
    %27 = arith.divf %25, %26 : vector<8x128xf32>
    %28 = vector.extract_strided_slice %10 {offsets = [0, 256], sizes = [8, 128], strides = [1, 1]} : vector<8x384xf32> to vector<8x128xf32>
    %29 = vector.extract_strided_slice %11 {offsets = [0, 256], sizes = [8, 128], strides = [1, 1]} : vector<8x384xf32> to vector<8x128xf32>
    %30 = arith.addf %29, %6 : vector<8x128xf32>
    %31 = arith.mulf %19, %30 : vector<8x128xf32>
    %32 = arith.addf %28, %31 : vector<8x128xf32>
    %33 = math.tanh %32 : vector<8x128xf32>
    %cst_11 = arith.constant 1.000000e+00 : f32
    %34 = vector.broadcast %cst_11 : f32 to vector<8x128xf32>
    %35 = arith.subf %34, %27 : vector<8x128xf32>
    %36 = arith.mulf %35, %33 : vector<8x128xf32>
    %37 = arith.mulf %27, %7 : vector<8x128xf32>
    %38 = arith.addf %36, %37 : vector<8x128xf32>
    %39 = arith.index_cast %c0_i32_6 : i32 to index
    %c0_12 = arith.constant 0 : index
    %c0_13 = arith.constant 0 : index
    %40 = vector.load %arg6[%39, %c0_12, %c0_13] : memref<8x8x128xf32, #tpu.memory_space<vmem>>, vector<1x8x128xf32>
    %41 = vector.shape_cast %40 : vector<1x8x128xf32> to vector<8x128xf32>
    %42 = vector.shape_cast %38 : vector<8x128xf32> to vector<1x8x128xf32>
    tpu.vector_store %arg6[%39, %c0_12, %c0_13], %42 {strides = array<i32>} : memref<8x8x128xf32, #tpu.memory_space<vmem>>, vector<1x8x128xf32>,
    %c1_i32 = arith.constant 1 : i32
    %43 = arith.index_cast %c1_i32 : i32 to index
    %c0_14 = arith.constant 0 : index
    %c0_15 = arith.constant 0 : index
    %44 = vector.load %arg2[%43, %c0_14, %c0_15] : memref<8x8x384xf32, #tpu.memory_space<vmem>>, vector<1x8x384xf32>
    %45 = vector.shape_cast %44 : vector<1x8x384xf32> to vector<8x384xf32>
    %cst_16 = arith.constant dense<0.000000e+00> : vector<8x384xf32>
    %46 = tpu.matmul %38, %3, %cst_16 {dimension_numbers = #tpu.dot_dimension_numbers<[1], [0], [0], [1], [0, 0, 1, 1], [], []>} : vector<8x128xf32>, vector<128x384xf32>, vector<8x384xf32> -> vector<8x384xf32>
    %47 = vector.extract_strided_slice %45 {offsets = [0, 0], sizes = [8, 128], strides = [1, 1]} : vector<8x384xf32> to vector<8x128xf32>
    %48 = vector.extract_strided_slice %46 {offsets = [0, 0], sizes = [8, 128], strides = [1, 1]} : vector<8x384xf32> to vector<8x128xf32>
    %49 = arith.addf %47, %48 : vector<8x128xf32>
    %50 = arith.negf %49 : vector<8x128xf32>
    %51 = math.exp %50 : vector<8x128xf32>
    %cst_17 = arith.constant 1.000000e+00 : f32
    %52 = vector.broadcast %cst_17 : f32 to vector<8x128xf32>
    %53 = arith.addf %52, %51 : vector<8x128xf32>
    %54 = arith.divf %52, %53 : vector<8x128xf32>
    %55 = vector.extract_strided_slice %45 {offsets = [0, 128], sizes = [8, 128], strides = [1, 1]} : vector<8x384xf32> to vector<8x128xf32>
    %56 = vector.extract_strided_slice %46 {offsets = [0, 128], sizes = [8, 128], strides = [1, 1]} : vector<8x384xf32> to vector<8x128xf32>
    %57 = arith.addf %55, %56 : vector<8x128xf32>
    %58 = arith.negf %57 : vector<8x128xf32>
    %59 = math.exp %58 : vector<8x128xf32>
    %cst_18 = arith.constant 1.000000e+00 : f32
    %60 = vector.broadcast %cst_18 : f32 to vector<8x128xf32>
    %61 = arith.addf %60, %59 : vector<8x128xf32>
    %62 = arith.divf %60, %61 : vector<8x128xf32>
    %63 = vector.extract_strided_slice %45 {offsets = [0, 256], sizes = [8, 128], strides = [1, 1]} : vector<8x384xf32> to vector<8x128xf32>
    %64 = vector.extract_strided_slice %46 {offsets = [0, 256], sizes = [8, 128], strides = [1, 1]} : vector<8x384xf32> to vector<8x128xf32>
    %65 = arith.addf %64, %6 : vector<8x128xf32>
    %66 = arith.mulf %54, %65 : vector<8x128xf32>
    %67 = arith.addf %63, %66 : vector<8x128xf32>
    %68 = math.tanh %67 : vector<8x128xf32>
    %cst_19 = arith.constant 1.000000e+00 : f32
    %69 = vector.broadcast %cst_19 : f32 to vector<8x128xf32>
    %70 = arith.subf %69, %62 : vector<8x128xf32>
    %71 = arith.mulf %70, %68 : vector<8x128xf32>
    %72 = arith.mulf %62, %38 : vector<8x128xf32>
    %73 = arith.addf %71, %72 : vector<8x128xf32>
    %74 = arith.index_cast %c1_i32 : i32 to index
    %c0_20 = arith.constant 0 : index
    %c0_21 = arith.constant 0 : index
    %75 = vector.load %arg6[%74, %c0_20, %c0_21] : memref<8x8x128xf32, #tpu.memory_space<vmem>>, vector<1x8x128xf32>
    %76 = vector.shape_cast %75 : vector<1x8x128xf32> to vector<8x128xf32>
    %77 = vector.shape_cast %73 : vector<8x128xf32> to vector<1x8x128xf32>
    tpu.vector_store %arg6[%74, %c0_20, %c0_21], %77 {strides = array<i32>} : memref<8x8x128xf32, #tpu.memory_space<vmem>>, vector<1x8x128xf32>,
    %c2_i32 = arith.constant 2 : i32
    %78 = arith.index_cast %c2_i32 : i32 to index
    %c0_22 = arith.constant 0 : index
    %c0_23 = arith.constant 0 : index
    %79 = vector.load %arg2[%78, %c0_22, %c0_23] : memref<8x8x384xf32, #tpu.memory_space<vmem>>, vector<1x8x384xf32>
    %80 = vector.shape_cast %79 : vector<1x8x384xf32> to vector<8x384xf32>
    %cst_24 = arith.constant dense<0.000000e+00> : vector<8x384xf32>
    %81 = tpu.matmul %73, %3, %cst_24 {dimension_numbers = #tpu.dot_dimension_numbers<[1], [0], [0], [1], [0, 0, 1, 1], [], []>} : vector<8x128xf32>, vector<128x384xf32>, vector<8x384xf32> -> vector<8x384xf32>
    %82 = vector.extract_strided_slice %80 {offsets = [0, 0], sizes = [8, 128], strides = [1, 1]} : vector<8x384xf32> to vector<8x128xf32>
    %83 = vector.extract_strided_slice %81 {offsets = [0, 0], sizes = [8, 128], strides = [1, 1]} : vector<8x384xf32> to vector<8x128xf32>
    %84 = arith.addf %82, %83 : vector<8x128xf32>
    %85 = arith.negf %84 : vector<8x128xf32>
    %86 = math.exp %85 : vector<8x128xf32>
    %cst_25 = arith.constant 1.000000e+00 : f32
    %87 = vector.broadcast %cst_25 : f32 to vector<8x128xf32>
    %88 = arith.addf %87, %86 : vector<8x128xf32>
    %89 = arith.divf %87, %88 : vector<8x128xf32>
    %90 = vector.extract_strided_slice %80 {offsets = [0, 128], sizes = [8, 128], strides = [1, 1]} : vector<8x384xf32> to vector<8x128xf32>
    %91 = vector.extract_strided_slice %81 {offsets = [0, 128], sizes = [8, 128], strides = [1, 1]} : vector<8x384xf32> to vector<8x128xf32>
    %92 = arith.addf %90, %91 : vector<8x128xf32>
    %93 = arith.negf %92 : vector<8x128xf32>
    %94 = math.exp %93 : vector<8x128xf32>
    %cst_26 = arith.constant 1.000000e+00 : f32
    %95 = vector.broadcast %cst_26 : f32 to vector<8x128xf32>
    %96 = arith.addf %95, %94 : vector<8x128xf32>
    %97 = arith.divf %95, %96 : vector<8x128xf32>
    %98 = vector.extract_strided_slice %80 {offsets = [0, 256], sizes = [8, 128], strides = [1, 1]} : vector<8x384xf32> to vector<8x128xf32>
    %99 = vector.extract_strided_slice %81 {offsets = [0, 256], sizes = [8, 128], strides = [1, 1]} : vector<8x384xf32> to vector<8x128xf32>
    %100 = arith.addf %99, %6 : vector<8x128xf32>
    %101 = arith.mulf %89, %100 : vector<8x128xf32>
    %102 = arith.addf %98, %101 : vector<8x128xf32>
    %103 = math.tanh %102 : vector<8x128xf32>
    %cst_27 = arith.constant 1.000000e+00 : f32
    %104 = vector.broadcast %cst_27 : f32 to vector<8x128xf32>
    %105 = arith.subf %104, %97 : vector<8x128xf32>
    %106 = arith.mulf %105, %103 : vector<8x128xf32>
    %107 = arith.mulf %97, %73 : vector<8x128xf32>
    %108 = arith.addf %106, %107 : vector<8x128xf32>
    %109 = arith.index_cast %c2_i32 : i32 to index
    %c0_28 = arith.constant 0 : index
    %c0_29 = arith.constant 0 : index
    %110 = vector.load %arg6[%109, %c0_28, %c0_29] : memref<8x8x128xf32, #tpu.memory_space<vmem>>, vector<1x8x128xf32>
    %111 = vector.shape_cast %110 : vector<1x8x128xf32> to vector<8x128xf32>
    %112 = vector.shape_cast %108 : vector<8x128xf32> to vector<1x8x128xf32>
    tpu.vector_store %arg6[%109, %c0_28, %c0_29], %112 {strides = array<i32>} : memref<8x8x128xf32, #tpu.memory_space<vmem>>, vector<1x8x128xf32>,
    %c3_i32 = arith.constant 3 : i32
    %113 = arith.index_cast %c3_i32 : i32 to index
    %c0_30 = arith.constant 0 : index
    %c0_31 = arith.constant 0 : index
    %114 = vector.load %arg2[%113, %c0_30, %c0_31] : memref<8x8x384xf32, #tpu.memory_space<vmem>>, vector<1x8x384xf32>
    %115 = vector.shape_cast %114 : vector<1x8x384xf32> to vector<8x384xf32>
    %cst_32 = arith.constant dense<0.000000e+00> : vector<8x384xf32>
    %116 = tpu.matmul %108, %3, %cst_32 {dimension_numbers = #tpu.dot_dimension_numbers<[1], [0], [0], [1], [0, 0, 1, 1], [], []>} : vector<8x128xf32>, vector<128x384xf32>, vector<8x384xf32> -> vector<8x384xf32>
    %117 = vector.extract_strided_slice %115 {offsets = [0, 0], sizes = [8, 128], strides = [1, 1]} : vector<8x384xf32> to vector<8x128xf32>
    %118 = vector.extract_strided_slice %116 {offsets = [0, 0], sizes = [8, 128], strides = [1, 1]} : vector<8x384xf32> to vector<8x128xf32>
    %119 = arith.addf %117, %118 : vector<8x128xf32>
    %120 = arith.negf %119 : vector<8x128xf32>
    %121 = math.exp %120 : vector<8x128xf32>
    %cst_33 = arith.constant 1.000000e+00 : f32
    %122 = vector.broadcast %cst_33 : f32 to vector<8x128xf32>
    %123 = arith.addf %122, %121 : vector<8x128xf32>
    %124 = arith.divf %122, %123 : vector<8x128xf32>
    %125 = vector.extract_strided_slice %115 {offsets = [0, 128], sizes = [8, 128], strides = [1, 1]} : vector<8x384xf32> to vector<8x128xf32>
    %126 = vector.extract_strided_slice %116 {offsets = [0, 128], sizes = [8, 128], strides = [1, 1]} : vector<8x384xf32> to vector<8x128xf32>
    %127 = arith.addf %125, %126 : vector<8x128xf32>
    %128 = arith.negf %127 : vector<8x128xf32>
    %129 = math.exp %128 : vector<8x128xf32>
    %cst_34 = arith.constant 1.000000e+00 : f32
    %130 = vector.broadcast %cst_34 : f32 to vector<8x128xf32>
    %131 = arith.addf %130, %129 : vector<8x128xf32>
    %132 = arith.divf %130, %131 : vector<8x128xf32>
    %133 = vector.extract_strided_slice %115 {offsets = [0, 256], sizes = [8, 128], strides = [1, 1]} : vector<8x384xf32> to vector<8x128xf32>
    %134 = vector.extract_strided_slice %116 {offsets = [0, 256], sizes = [8, 128], strides = [1, 1]} : vector<8x384xf32> to vector<8x128xf32>
    %135 = arith.addf %134, %6 : vector<8x128xf32>
    %136 = arith.mulf %124, %135 : vector<8x128xf32>
    %137 = arith.addf %133, %136 : vector<8x128xf32>
    %138 = math.tanh %137 : vector<8x128xf32>
    %cst_35 = arith.constant 1.000000e+00 : f32
    %139 = vector.broadcast %cst_35 : f32 to vector<8x128xf32>
    %140 = arith.subf %139, %132 : vector<8x128xf32>
    %141 = arith.mulf %140, %138 : vector<8x128xf32>
    %142 = arith.mulf %132, %108 : vector<8x128xf32>
    %143 = arith.addf %141, %142 : vector<8x128xf32>
    %144 = arith.index_cast %c3_i32 : i32 to index
    %c0_36 = arith.constant 0 : index
    %c0_37 = arith.constant 0 : index
    %145 = vector.load %arg6[%144, %c0_36, %c0_37] : memref<8x8x128xf32, #tpu.memory_space<vmem>>, vector<1x8x128xf32>
    %146 = vector.shape_cast %145 : vector<1x8x128xf32> to vector<8x128xf32>
    %147 = vector.shape_cast %143 : vector<8x128xf32> to vector<1x8x128xf32>
    tpu.vector_store %arg6[%144, %c0_36, %c0_37], %147 {strides = array<i32>} : memref<8x8x128xf32, #tpu.memory_space<vmem>>, vector<1x8x128xf32>,
    %c4_i32 = arith.constant 4 : i32
    %148 = arith.index_cast %c4_i32 : i32 to index
    %c0_38 = arith.constant 0 : index
    %c0_39 = arith.constant 0 : index
    %149 = vector.load %arg2[%148, %c0_38, %c0_39] : memref<8x8x384xf32, #tpu.memory_space<vmem>>, vector<1x8x384xf32>
    %150 = vector.shape_cast %149 : vector<1x8x384xf32> to vector<8x384xf32>
    %cst_40 = arith.constant dense<0.000000e+00> : vector<8x384xf32>
    %151 = tpu.matmul %143, %3, %cst_40 {dimension_numbers = #tpu.dot_dimension_numbers<[1], [0], [0], [1], [0, 0, 1, 1], [], []>} : vector<8x128xf32>, vector<128x384xf32>, vector<8x384xf32> -> vector<8x384xf32>
    %152 = vector.extract_strided_slice %150 {offsets = [0, 0], sizes = [8, 128], strides = [1, 1]} : vector<8x384xf32> to vector<8x128xf32>
    %153 = vector.extract_strided_slice %151 {offsets = [0, 0], sizes = [8, 128], strides = [1, 1]} : vector<8x384xf32> to vector<8x128xf32>
    %154 = arith.addf %152, %153 : vector<8x128xf32>
    %155 = arith.negf %154 : vector<8x128xf32>
    %156 = math.exp %155 : vector<8x128xf32>
    %cst_41 = arith.constant 1.000000e+00 : f32
    %157 = vector.broadcast %cst_41 : f32 to vector<8x128xf32>
    %158 = arith.addf %157, %156 : vector<8x128xf32>
    %159 = arith.divf %157, %158 : vector<8x128xf32>
    %160 = vector.extract_strided_slice %150 {offsets = [0, 128], sizes = [8, 128], strides = [1, 1]} : vector<8x384xf32> to vector<8x128xf32>
    %161 = vector.extract_strided_slice %151 {offsets = [0, 128], sizes = [8, 128], strides = [1, 1]} : vector<8x384xf32> to vector<8x128xf32>
    %162 = arith.addf %160, %161 : vector<8x128xf32>
    %163 = arith.negf %162 : vector<8x128xf32>
    %164 = math.exp %163 : vector<8x128xf32>
    %cst_42 = arith.constant 1.000000e+00 : f32
    %165 = vector.broadcast %cst_42 : f32 to vector<8x128xf32>
    %166 = arith.addf %165, %164 : vector<8x128xf32>
    %167 = arith.divf %165, %166 : vector<8x128xf32>
    %168 = vector.extract_strided_slice %150 {offsets = [0, 256], sizes = [8, 128], strides = [1, 1]} : vector<8x384xf32> to vector<8x128xf32>
    %169 = vector.extract_strided_slice %151 {offsets = [0, 256], sizes = [8, 128], strides = [1, 1]} : vector<8x384xf32> to vector<8x128xf32>
    %170 = arith.addf %169, %6 : vector<8x128xf32>
    %171 = arith.mulf %159, %170 : vector<8x128xf32>
    %172 = arith.addf %168, %171 : vector<8x128xf32>
    %173 = math.tanh %172 : vector<8x128xf32>
    %cst_43 = arith.constant 1.000000e+00 : f32
    %174 = vector.broadcast %cst_43 : f32 to vector<8x128xf32>
    %175 = arith.subf %174, %167 : vector<8x128xf32>
    %176 = arith.mulf %175, %173 : vector<8x128xf32>
    %177 = arith.mulf %167, %143 : vector<8x128xf32>
    %178 = arith.addf %176, %177 : vector<8x128xf32>
    %179 = arith.index_cast %c4_i32 : i32 to index
    %c0_44 = arith.constant 0 : index
    %c0_45 = arith.constant 0 : index
    %180 = vector.load %arg6[%179, %c0_44, %c0_45] : memref<8x8x128xf32, #tpu.memory_space<vmem>>, vector<1x8x128xf32>
    %181 = vector.shape_cast %180 : vector<1x8x128xf32> to vector<8x128xf32>
    %182 = vector.shape_cast %178 : vector<8x128xf32> to vector<1x8x128xf32>
    tpu.vector_store %arg6[%179, %c0_44, %c0_45], %182 {strides = array<i32>} : memref<8x8x128xf32, #tpu.memory_space<vmem>>, vector<1x8x128xf32>,
    %c5_i32 = arith.constant 5 : i32
    %183 = arith.index_cast %c5_i32 : i32 to index
    %c0_46 = arith.constant 0 : index
    %c0_47 = arith.constant 0 : index
    %184 = vector.load %arg2[%183, %c0_46, %c0_47] : memref<8x8x384xf32, #tpu.memory_space<vmem>>, vector<1x8x384xf32>
    %185 = vector.shape_cast %184 : vector<1x8x384xf32> to vector<8x384xf32>
    %cst_48 = arith.constant dense<0.000000e+00> : vector<8x384xf32>
    %186 = tpu.matmul %178, %3, %cst_48 {dimension_numbers = #tpu.dot_dimension_numbers<[1], [0], [0], [1], [0, 0, 1, 1], [], []>} : vector<8x128xf32>, vector<128x384xf32>, vector<8x384xf32> -> vector<8x384xf32>
    %187 = vector.extract_strided_slice %185 {offsets = [0, 0], sizes = [8, 128], strides = [1, 1]} : vector<8x384xf32> to vector<8x128xf32>
    %188 = vector.extract_strided_slice %186 {offsets = [0, 0], sizes = [8, 128], strides = [1, 1]} : vector<8x384xf32> to vector<8x128xf32>
    %189 = arith.addf %187, %188 : vector<8x128xf32>
    %190 = arith.negf %189 : vector<8x128xf32>
    %191 = math.exp %190 : vector<8x128xf32>
    %cst_49 = arith.constant 1.000000e+00 : f32
    %192 = vector.broadcast %cst_49 : f32 to vector<8x128xf32>
    %193 = arith.addf %192, %191 : vector<8x128xf32>
    %194 = arith.divf %192, %193 : vector<8x128xf32>
    %195 = vector.extract_strided_slice %185 {offsets = [0, 128], sizes = [8, 128], strides = [1, 1]} : vector<8x384xf32> to vector<8x128xf32>
    %196 = vector.extract_strided_slice %186 {offsets = [0, 128], sizes = [8, 128], strides = [1, 1]} : vector<8x384xf32> to vector<8x128xf32>
    %197 = arith.addf %195, %196 : vector<8x128xf32>
    %198 = arith.negf %197 : vector<8x128xf32>
    %199 = math.exp %198 : vector<8x128xf32>
    %cst_50 = arith.constant 1.000000e+00 : f32
    %200 = vector.broadcast %cst_50 : f32 to vector<8x128xf32>
    %201 = arith.addf %200, %199 : vector<8x128xf32>
    %202 = arith.divf %200, %201 : vector<8x128xf32>
    %203 = vector.extract_strided_slice %185 {offsets = [0, 256], sizes = [8, 128], strides = [1, 1]} : vector<8x384xf32> to vector<8x128xf32>
    %204 = vector.extract_strided_slice %186 {offsets = [0, 256], sizes = [8, 128], strides = [1, 1]} : vector<8x384xf32> to vector<8x128xf32>
    %205 = arith.addf %204, %6 : vector<8x128xf32>
    %206 = arith.mulf %194, %205 : vector<8x128xf32>
    %207 = arith.addf %203, %206 : vector<8x128xf32>
    %208 = math.tanh %207 : vector<8x128xf32>
    %cst_51 = arith.constant 1.000000e+00 : f32
    %209 = vector.broadcast %cst_51 : f32 to vector<8x128xf32>
    %210 = arith.subf %209, %202 : vector<8x128xf32>
    %211 = arith.mulf %210, %208 : vector<8x128xf32>
    %212 = arith.mulf %202, %178 : vector<8x128xf32>
    %213 = arith.addf %211, %212 : vector<8x128xf32>
    %214 = arith.index_cast %c5_i32 : i32 to index
    %c0_52 = arith.constant 0 : index
    %c0_53 = arith.constant 0 : index
    %215 = vector.load %arg6[%214, %c0_52, %c0_53] : memref<8x8x128xf32, #tpu.memory_space<vmem>>, vector<1x8x128xf32>
    %216 = vector.shape_cast %215 : vector<1x8x128xf32> to vector<8x128xf32>
    %217 = vector.shape_cast %213 : vector<8x128xf32> to vector<1x8x128xf32>
    tpu.vector_store %arg6[%214, %c0_52, %c0_53], %217 {strides = array<i32>} : memref<8x8x128xf32, #tpu.memory_space<vmem>>, vector<1x8x128xf32>,
    %c6_i32 = arith.constant 6 : i32
    %218 = arith.index_cast %c6_i32 : i32 to index
    %c0_54 = arith.constant 0 : index
    %c0_55 = arith.constant 0 : index
    %219 = vector.load %arg2[%218, %c0_54, %c0_55] : memref<8x8x384xf32, #tpu.memory_space<vmem>>, vector<1x8x384xf32>
    %220 = vector.shape_cast %219 : vector<1x8x384xf32> to vector<8x384xf32>
    %cst_56 = arith.constant dense<0.000000e+00> : vector<8x384xf32>
    %221 = tpu.matmul %213, %3, %cst_56 {dimension_numbers = #tpu.dot_dimension_numbers<[1], [0], [0], [1], [0, 0, 1, 1], [], []>} : vector<8x128xf32>, vector<128x384xf32>, vector<8x384xf32> -> vector<8x384xf32>
    %222 = vector.extract_strided_slice %220 {offsets = [0, 0], sizes = [8, 128], strides = [1, 1]} : vector<8x384xf32> to vector<8x128xf32>
    %223 = vector.extract_strided_slice %221 {offsets = [0, 0], sizes = [8, 128], strides = [1, 1]} : vector<8x384xf32> to vector<8x128xf32>
    %224 = arith.addf %222, %223 : vector<8x128xf32>
    %225 = arith.negf %224 : vector<8x128xf32>
    %226 = math.exp %225 : vector<8x128xf32>
    %cst_57 = arith.constant 1.000000e+00 : f32
    %227 = vector.broadcast %cst_57 : f32 to vector<8x128xf32>
    %228 = arith.addf %227, %226 : vector<8x128xf32>
    %229 = arith.divf %227, %228 : vector<8x128xf32>
    %230 = vector.extract_strided_slice %220 {offsets = [0, 128], sizes = [8, 128], strides = [1, 1]} : vector<8x384xf32> to vector<8x128xf32>
    %231 = vector.extract_strided_slice %221 {offsets = [0, 128], sizes = [8, 128], strides = [1, 1]} : vector<8x384xf32> to vector<8x128xf32>
    %232 = arith.addf %230, %231 : vector<8x128xf32>
    %233 = arith.negf %232 : vector<8x128xf32>
    %234 = math.exp %233 : vector<8x128xf32>
    %cst_58 = arith.constant 1.000000e+00 : f32
    %235 = vector.broadcast %cst_58 : f32 to vector<8x128xf32>
    %236 = arith.addf %235, %234 : vector<8x128xf32>
    %237 = arith.divf %235, %236 : vector<8x128xf32>
    %238 = vector.extract_strided_slice %220 {offsets = [0, 256], sizes = [8, 128], strides = [1, 1]} : vector<8x384xf32> to vector<8x128xf32>
    %239 = vector.extract_strided_slice %221 {offsets = [0, 256], sizes = [8, 128], strides = [1, 1]} : vector<8x384xf32> to vector<8x128xf32>
    %240 = arith.addf %239, %6 : vector<8x128xf32>
    %241 = arith.mulf %229, %240 : vector<8x128xf32>
    %242 = arith.addf %238, %241 : vector<8x128xf32>
    %243 = math.tanh %242 : vector<8x128xf32>
    %cst_59 = arith.constant 1.000000e+00 : f32
    %244 = vector.broadcast %cst_59 : f32 to vector<8x128xf32>
    %245 = arith.subf %244, %237 : vector<8x128xf32>
    %246 = arith.mulf %245, %243 : vector<8x128xf32>
    %247 = arith.mulf %237, %213 : vector<8x128xf32>
    %248 = arith.addf %246, %247 : vector<8x128xf32>
    %249 = arith.index_cast %c6_i32 : i32 to index
    %c0_60 = arith.constant 0 : index
    %c0_61 = arith.constant 0 : index
    %250 = vector.load %arg6[%249, %c0_60, %c0_61] : memref<8x8x128xf32, #tpu.memory_space<vmem>>, vector<1x8x128xf32>
    %251 = vector.shape_cast %250 : vector<1x8x128xf32> to vector<8x128xf32>
    %252 = vector.shape_cast %248 : vector<8x128xf32> to vector<1x8x128xf32>
    tpu.vector_store %arg6[%249, %c0_60, %c0_61], %252 {strides = array<i32>} : memref<8x8x128xf32, #tpu.memory_space<vmem>>, vector<1x8x128xf32>,
    %c7_i32 = arith.constant 7 : i32
    %253 = arith.index_cast %c7_i32 : i32 to index
    %c0_62 = arith.constant 0 : index
    %c0_63 = arith.constant 0 : index
    %254 = vector.load %arg2[%253, %c0_62, %c0_63] : memref<8x8x384xf32, #tpu.memory_space<vmem>>, vector<1x8x384xf32>
    %255 = vector.shape_cast %254 : vector<1x8x384xf32> to vector<8x384xf32>
    %cst_64 = arith.constant dense<0.000000e+00> : vector<8x384xf32>
    %256 = tpu.matmul %248, %3, %cst_64 {dimension_numbers = #tpu.dot_dimension_numbers<[1], [0], [0], [1], [0, 0, 1, 1], [], []>} : vector<8x128xf32>, vector<128x384xf32>, vector<8x384xf32> -> vector<8x384xf32>
    %257 = vector.extract_strided_slice %255 {offsets = [0, 0], sizes = [8, 128], strides = [1, 1]} : vector<8x384xf32> to vector<8x128xf32>
    %258 = vector.extract_strided_slice %256 {offsets = [0, 0], sizes = [8, 128], strides = [1, 1]} : vector<8x384xf32> to vector<8x128xf32>
    %259 = arith.addf %257, %258 : vector<8x128xf32>
    %260 = arith.negf %259 : vector<8x128xf32>
    %261 = math.exp %260 : vector<8x128xf32>
    %cst_65 = arith.constant 1.000000e+00 : f32
    %262 = vector.broadcast %cst_65 : f32 to vector<8x128xf32>
    %263 = arith.addf %262, %261 : vector<8x128xf32>
    %264 = arith.divf %262, %263 : vector<8x128xf32>
    %265 = vector.extract_strided_slice %255 {offsets = [0, 128], sizes = [8, 128], strides = [1, 1]} : vector<8x384xf32> to vector<8x128xf32>
    %266 = vector.extract_strided_slice %256 {offsets = [0, 128], sizes = [8, 128], strides = [1, 1]} : vector<8x384xf32> to vector<8x128xf32>
    %267 = arith.addf %265, %266 : vector<8x128xf32>
    %268 = arith.negf %267 : vector<8x128xf32>
    %269 = math.exp %268 : vector<8x128xf32>
    %cst_66 = arith.constant 1.000000e+00 : f32
    %270 = vector.broadcast %cst_66 : f32 to vector<8x128xf32>
    %271 = arith.addf %270, %269 : vector<8x128xf32>
    %272 = arith.divf %270, %271 : vector<8x128xf32>
    %273 = vector.extract_strided_slice %255 {offsets = [0, 256], sizes = [8, 128], strides = [1, 1]} : vector<8x384xf32> to vector<8x128xf32>
    %274 = vector.extract_strided_slice %256 {offsets = [0, 256], sizes = [8, 128], strides = [1, 1]} : vector<8x384xf32> to vector<8x128xf32>
    %275 = arith.addf %274, %6 : vector<8x128xf32>
    %276 = arith.mulf %264, %275 : vector<8x128xf32>
    %277 = arith.addf %273, %276 : vector<8x128xf32>
    %278 = math.tanh %277 : vector<8x128xf32>
    %cst_67 = arith.constant 1.000000e+00 : f32
    %279 = vector.broadcast %cst_67 : f32 to vector<8x128xf32>
    %280 = arith.subf %279, %272 : vector<8x128xf32>
    %281 = arith.mulf %280, %278 : vector<8x128xf32>
    %282 = arith.mulf %272, %248 : vector<8x128xf32>
    %283 = arith.addf %281, %282 : vector<8x128xf32>
    %284 = arith.index_cast %c7_i32 : i32 to index
    %c0_68 = arith.constant 0 : index
    %c0_69 = arith.constant 0 : index
    %285 = vector.load %arg6[%284, %c0_68, %c0_69] : memref<8x8x128xf32, #tpu.memory_space<vmem>>, vector<1x8x128xf32>
    %286 = vector.shape_cast %285 : vector<1x8x128xf32> to vector<8x128xf32>
    %287 = vector.shape_cast %283 : vector<8x128xf32> to vector<1x8x128xf32>
    tpu.vector_store %arg6[%284, %c0_68, %c0_69], %287 {strides = array<i32>} : memref<8x8x128xf32, #tpu.memory_space<vmem>>, vector<1x8x128xf32>,
    %c8_i32 = arith.constant 8 : i32
    %c0_70 = arith.constant 0 : index
    %c0_71 = arith.constant 0 : index
    %288 = vector.load %arg7[%c0_70, %c0_71] : memref<8x128xf32, #tpu.memory_space<vmem>>, vector<8x128xf32>
    tpu.vector_store %arg7[%c0_70, %c0_71], %283 {strides = array<i32>} : memref<8x128xf32, #tpu.memory_space<vmem>>, vector<8x128xf32>,
    return
  }
  func.func @transform_0(%arg0: i32, %arg1: i32) -> (i32, i32, i32) {
    %c0_i32 = arith.constant 0 : i32
    %c0_i32_0 = arith.constant 0 : i32
    return %arg1, %arg0, %c0_i32 : i32, i32, i32
  }
  func.func @transform_1(%arg0: i32, %arg1: i32) -> (i32, i32) {
    %c0_i32 = arith.constant 0 : i32
    %c0_i32_0 = arith.constant 0 : i32
    return %arg0, %c0_i32 : i32, i32
  }
  func.func @transform_2(%arg0: i32, %arg1: i32) -> (i32, i32) {
    %c0_i32 = arith.constant 0 : i32
    %c0_i32_0 = arith.constant 0 : i32
    %c0_i32_1 = arith.constant 0 : i32
    return %c0_i32, %c0_i32_0 : i32, i32
  }
  func.func @transform_3(%arg0: i32, %arg1: i32) -> (i32, i32) {
    %c0_i32 = arith.constant 0 : i32
    %c0_i32_0 = arith.constant 0 : i32
    %c0_i32_1 = arith.constant 0 : i32
    return %c0_i32, %c0_i32_0 : i32, i32
  }
  func.func @transform_4(%arg0: i32, %arg1: i32) -> (i32, i32, i32) {
    %c0_i32 = arith.constant 0 : i32
    %c0_i32_0 = arith.constant 0 : i32
    return %arg1, %arg0, %c0_i32 : i32, i32, i32
  }
}

module attributes {stable_mosaic.version = 11 : i64} {
  func.func @xproj_kernel(%arg0: i32, %arg1: memref<64x128xf32, #tpu.memory_space<vmem>>, %arg2: memref<128x512xf32, #tpu.memory_space<vmem>>, %arg3: memref<1x512xf32, #tpu.memory_space<vmem>>, %arg4: memref<64x384xf32, #tpu.memory_space<vmem>>, %arg5: memref<64x128xf32, #tpu.memory_space<vmem>>) attributes {dimension_semantics = [#tpu.dimension_semantics<parallel>], iteration_bounds = array<i64: 1>, scalar_prefetch = 0 : i64, scratch_operands = 0 : i64, tpu.core_type = #tpu.core_type<tc>, window_params = [{transform_indices = @transform_0, window_bounds = array<i64: 64, 128>}, {pipeline_mode = #tpu.pipeline_mode<synchronous>, transform_indices = @transform_1, window_bounds = array<i64: 128, 512>}, {pipeline_mode = #tpu.pipeline_mode<synchronous>, transform_indices = @transform_2, window_bounds = array<i64: 1, 512>}, {transform_indices = @transform_3, window_bounds = array<i64: 64, 384>}, {transform_indices = @transform_4, window_bounds = array<i64: 64, 128>}]} {
    %c0 = arith.constant 0 : index
    %c0_0 = arith.constant 0 : index
    %0 = vector.load %arg1[%c0, %c0_0] : memref<64x128xf32, #tpu.memory_space<vmem>>, vector<64x128xf32>
    %c0_1 = arith.constant 0 : index
    %c0_2 = arith.constant 0 : index
    %1 = vector.load %arg2[%c0_1, %c0_2] : memref<128x512xf32, #tpu.memory_space<vmem>>, vector<128x512xf32>
    %cst = arith.constant dense<0.000000e+00> : vector<64x512xf32>
    %2 = tpu.matmul %0, %1, %cst {dimension_numbers = #tpu.dot_dimension_numbers<[1], [0], [0], [1], [0, 0, 1, 1], [], []>} : vector<64x128xf32>, vector<128x512xf32>, vector<64x512xf32> -> vector<64x512xf32>
    %c0_3 = arith.constant 0 : index
    %c0_4 = arith.constant 0 : index
    %3 = vector.load %arg3[%c0_3, %c0_4] : memref<1x512xf32, #tpu.memory_space<vmem>>, vector<1x512xf32>
    %4 = vector.broadcast %3 : vector<1x512xf32> to vector<64x512xf32>
    %5 = arith.addf %2, %4 : vector<64x512xf32>
    %6 = vector.extract_strided_slice %5 {offsets = [0, 0], sizes = [64, 384], strides = [1, 1]} : vector<64x512xf32> to vector<64x384xf32>
    %c0_5 = arith.constant 0 : index
    %c0_6 = arith.constant 0 : index
    %7 = vector.load %arg4[%c0_5, %c0_6] : memref<64x384xf32, #tpu.memory_space<vmem>>, vector<64x384xf32>
    tpu.vector_store %arg4[%c0_5, %c0_6], %6 {strides = array<i32>} : memref<64x384xf32, #tpu.memory_space<vmem>>, vector<64x384xf32>,
    %8 = vector.extract_strided_slice %5 {offsets = [0, 384], sizes = [64, 128], strides = [1, 1]} : vector<64x512xf32> to vector<64x128xf32>
    %c0_7 = arith.constant 0 : index
    %c0_8 = arith.constant 0 : index
    %9 = vector.load %arg5[%c0_7, %c0_8] : memref<64x128xf32, #tpu.memory_space<vmem>>, vector<64x128xf32>
    tpu.vector_store %arg5[%c0_7, %c0_8], %8 {strides = array<i32>} : memref<64x128xf32, #tpu.memory_space<vmem>>, vector<64x128xf32>,
    return
  }
  func.func @transform_0(%arg0: i32) -> (i32, i32) {
    %c0_i32 = arith.constant 0 : i32
    %c0_i32_0 = arith.constant 0 : i32
    return %arg0, %c0_i32 : i32, i32
  }
  func.func @transform_1(%arg0: i32) -> (i32, i32) {
    %c0_i32 = arith.constant 0 : i32
    %c0_i32_0 = arith.constant 0 : i32
    %c0_i32_1 = arith.constant 0 : i32
    return %c0_i32, %c0_i32_0 : i32, i32
  }
  func.func @transform_2(%arg0: i32) -> (i32, i32) {
    %c0_i32 = arith.constant 0 : i32
    %c0_i32_0 = arith.constant 0 : i32
    %c0_i32_1 = arith.constant 0 : i32
    return %c0_i32, %c0_i32_0 : i32, i32
  }
  func.func @transform_3(%arg0: i32) -> (i32, i32) {
    %c0_i32 = arith.constant 0 : i32
    %c0_i32_0 = arith.constant 0 : i32
    return %arg0, %c0_i32 : i32, i32
  }
  func.func @transform_4(%arg0: i32) -> (i32, i32) {
    %c0_i32 = arith.constant 0 : i32
    %c0_i32_0 = arith.constant 0 : i32
    return %arg0, %c0_i32 : i32, i32
  }
}

module attributes {stable_mosaic.version = 11 : i64} {
  func.func @hproj_kernel(%arg0: i32, %arg1: memref<64x128xf32, #tpu.memory_space<vmem>>, %arg2: memref<64x128xf32, #tpu.memory_space<vmem>>, %arg3: memref<128x256xf32, #tpu.memory_space<vmem>>, %arg4: memref<1x256xf32, #tpu.memory_space<vmem>>, %arg5: memref<64x128xf32, #tpu.memory_space<vmem>>, %arg6: memref<64x128xf32, #tpu.memory_space<vmem>>) attributes {dimension_semantics = [#tpu.dimension_semantics<parallel>], iteration_bounds = array<i64: 1>, scalar_prefetch = 0 : i64, scratch_operands = 0 : i64, tpu.core_type = #tpu.core_type<tc>, window_params = [{transform_indices = @transform_0, window_bounds = array<i64: 64, 128>}, {transform_indices = @transform_1, window_bounds = array<i64: 64, 128>}, {pipeline_mode = #tpu.pipeline_mode<synchronous>, transform_indices = @transform_2, window_bounds = array<i64: 128, 256>}, {pipeline_mode = #tpu.pipeline_mode<synchronous>, transform_indices = @transform_3, window_bounds = array<i64: 1, 256>}, {transform_indices = @transform_4, window_bounds = array<i64: 64, 128>}, {transform_indices = @transform_5, window_bounds = array<i64: 64, 128>}]} {
    %c0 = arith.constant 0 : index
    %c0_0 = arith.constant 0 : index
    %0 = vector.load %arg1[%c0, %c0_0] : memref<64x128xf32, #tpu.memory_space<vmem>>, vector<64x128xf32>
    %c0_1 = arith.constant 0 : index
    %c0_2 = arith.constant 0 : index
    %1 = vector.load %arg3[%c0_1, %c0_2] : memref<128x256xf32, #tpu.memory_space<vmem>>, vector<128x256xf32>
    %cst = arith.constant dense<0.000000e+00> : vector<64x256xf32>
    %2 = tpu.matmul %0, %1, %cst {dimension_numbers = #tpu.dot_dimension_numbers<[1], [0], [0], [1], [0, 0, 1, 1], [], []>} : vector<64x128xf32>, vector<128x256xf32>, vector<64x256xf32> -> vector<64x256xf32>
    %c0_3 = arith.constant 0 : index
    %c0_4 = arith.constant 0 : index
    %3 = vector.load %arg4[%c0_3, %c0_4] : memref<1x256xf32, #tpu.memory_space<vmem>>, vector<1x256xf32>
    %4 = vector.broadcast %3 : vector<1x256xf32> to vector<64x256xf32>
    %5 = arith.addf %2, %4 : vector<64x256xf32>
    %6 = vector.extract_strided_slice %5 {offsets = [0, 0], sizes = [64, 128], strides = [1, 1]} : vector<64x256xf32> to vector<64x128xf32>
    %c0_5 = arith.constant 0 : index
    %c0_6 = arith.constant 0 : index
    %7 = vector.load %arg5[%c0_5, %c0_6] : memref<64x128xf32, #tpu.memory_space<vmem>>, vector<64x128xf32>
    tpu.vector_store %arg5[%c0_5, %c0_6], %6 {strides = array<i32>} : memref<64x128xf32, #tpu.memory_space<vmem>>, vector<64x128xf32>,
    %8 = vector.extract_strided_slice %5 {offsets = [0, 128], sizes = [64, 128], strides = [1, 1]} : vector<64x256xf32> to vector<64x128xf32>
    %c0_7 = arith.constant 0 : index
    %c0_8 = arith.constant 0 : index
    %9 = vector.load %arg2[%c0_7, %c0_8] : memref<64x128xf32, #tpu.memory_space<vmem>>, vector<64x128xf32>
    %10 = arith.addf %8, %9 : vector<64x128xf32>
    %c0_9 = arith.constant 0 : index
    %c0_10 = arith.constant 0 : index
    %11 = vector.load %arg6[%c0_9, %c0_10] : memref<64x128xf32, #tpu.memory_space<vmem>>, vector<64x128xf32>
    tpu.vector_store %arg6[%c0_9, %c0_10], %10 {strides = array<i32>} : memref<64x128xf32, #tpu.memory_space<vmem>>, vector<64x128xf32>,
    return
  }
  func.func @transform_0(%arg0: i32) -> (i32, i32) {
    %c0_i32 = arith.constant 0 : i32
    %c0_i32_0 = arith.constant 0 : i32
    return %arg0, %c0_i32 : i32, i32
  }
  func.func @transform_1(%arg0: i32) -> (i32, i32) {
    %c0_i32 = arith.constant 0 : i32
    %c0_i32_0 = arith.constant 0 : i32
    return %arg0, %c0_i32 : i32, i32
  }
  func.func @transform_2(%arg0: i32) -> (i32, i32) {
    %c0_i32 = arith.constant 0 : i32
    %c0_i32_0 = arith.constant 0 : i32
    %c0_i32_1 = arith.constant 0 : i32
    return %c0_i32, %c0_i32_0 : i32, i32
  }
  func.func @transform_3(%arg0: i32) -> (i32, i32) {
    %c0_i32 = arith.constant 0 : i32
    %c0_i32_0 = arith.constant 0 : i32
    %c0_i32_1 = arith.constant 0 : i32
    return %c0_i32, %c0_i32_0 : i32, i32
  }
  func.func @transform_4(%arg0: i32) -> (i32, i32) {
    %c0_i32 = arith.constant 0 : i32
    %c0_i32_0 = arith.constant 0 : i32
    return %arg0, %c0_i32 : i32, i32
  }
  func.func @transform_5(%arg0: i32) -> (i32, i32) {
    %c0_i32 = arith.constant 0 : i32
    %c0_i32_0 = arith.constant 0 : i32
    return %arg0, %c0_i32 : i32, i32
  }
}

</mosaic_0001>

<bundles_post_ra>
// kernel: rssm_sequence.5
= control target key start
LH: loop header
LB: loop body
LE: loop exit
PB: predicated region body
PF: predicated region fallthrough
CT: control target
= control target key end

     0   :  { %11 = vsyncpa [#allocation3], 0  ;;  %s664_s0 = inlined_call_operand.hbm [shape: f32[64,128], index: 0, kind: input, shape index: {}]   ;;  %s665_s1 = inlined_call_operand.hbm [shape: f32[64,128], index: 1, kind: input, shape index: {}]   ;;  %s666_s2 = inlined_call_operand.hbm [shape: f32[128,256], index: 2, kind: input, shape index: {}]   ;;  %s667_s3 = inlined_call_operand.hbm [shape: f32[1,256], index: 3, kind: input, shape index: {}]   ;;  %s668_s4 = inlined_call_operand.hbm [shape: f32[64,128], index: 4, kind: output, shape index: {0}]   ;;  %s669_s5 = inlined_call_operand.hbm [shape: f32[64,128], index: 5, kind: output, shape index: {1}]  }
   0x1   :  { %12 = vsyncpa [#allocation6], 0 }
   0x2   :  { %13 = vsyncpa [#allocation9], 0 }
   0x3   :  { %14 = vsyncpa [#allocation4], 0 }
   0x4   :  { %15 = vsyncpa [#allocation12], 0  ;;  %s507_s18 = smov [#allocation5]   ;;  %s508_s20 = smov [#allocation2]  }
   0x5   :  { %s33_s19 = sshll.u32 %s507_s18, 4  ;;  %s21_s21 = sshll.u32 %s508_s20, 4  ;;  %s34_s19 = int_to_ptr.vmem [resolvable:$true] %s33_s19  ;;  %s548_s21 = int_to_ptr.vmem [resolvable:$true] %s21_s21 }
   0x6   :  { %s365_s24 = scalar_lea.hbm %s665_s1, 1024 }
   0x7   :  { %p366_p0 = scmp.ne.s32.totalorder %s665_s1, %s365_s24  ;;  %p369_p1 = scmp.lt.u32.totalorder %s365_s24, %s665_s1 }
   0x9   :  { %p371_p2 = pnand %p369_p1, %p366_p0 }
   0xb   :  { %374 = shalt.err (!%p371_p2)
}
   0xc   :  { %s375_s29 = scalar_lea.vmem %s34_s19, 1024  ;;  %p380_p4 = scmp.lt.s32.totalorder %s34_s19, %s34_s19 }
   0xd   :  { %p376_p3 = scmp.ne.s32.totalorder %s34_s19, %s375_s29  ;;  %p381_p5 = scmp.lt.s32.totalorder %s375_s29, %s375_s29 }
   0xf   :  { %p382_p6 = por %p381_p5, %p380_p4 }
  0x11   :  { %p383_p7 = pnand %p382_p6, %p376_p3 }
  0x13   :  { %386 = shalt.err (!%p383_p7)
}
  0x14   :  { %s509_s30 = smov 128   ;;  %s510_s6 = smov 8  }
  0x15   :  { %39 = dma.hbm_to_vmem [thread:$0]  %s665_s1, 1024, %s34_s19, [#allocation6], %s509_s30, %s509_s30, %s510_s6  }
  0x16   :  { %s387_s11 = scalar_lea.hbm %s664_s0, 1024 }
  0x17   :  { %p388_p8 = scmp.ne.s32.totalorder %s664_s0, %s387_s11  ;;  %p391_p9 = scmp.lt.u32.totalorder %s387_s11, %s664_s0 }
  0x19   :  { %p393_p10 = pnand %p391_p9, %p388_p8 }
  0x1b   :  { %396 = shalt.err (!%p393_p10)
}
  0x1c   :  { %s397_s16 = scalar_lea.vmem %s548_s21, 1024  ;;  %p402_p12 = scmp.lt.s32.totalorder %s548_s21, %s548_s21 }
  0x1d   :  { %p398_p11 = scmp.ne.s32.totalorder %s548_s21, %s397_s16  ;;  %p403_p13 = scmp.lt.s32.totalorder %s397_s16, %s397_s16 }
  0x1f   :  { %p404_p0 = por %p403_p13, %p402_p12 }
  0x21   :  { %p405_p1 = pnand %p404_p0, %p398_p11 }
  0x23   :  { %408 = shalt.err (!%p405_p1)
}
  0x24   :  { %27 = dma.hbm_to_vmem [thread:$0]  %s664_s0, 1024, %s548_s21, [#allocation3], %s509_s30, %s509_s30, %s510_s6  }
  0x25   :  { %s511_s18 = smov [#allocation7]   ;;  %s409_s23 = scalar_lea.hbm %s666_s2, 4096 }
  0x26   :  { %s45_s19 = sshll.u32 %s511_s18, 4  ;;  %p410_p2 = scmp.ne.s32.totalorder %s666_s2, %s409_s23  ;;  %s46_s19 = int_to_ptr.vmem [resolvable:$true] %s45_s19 }
  0x27   :  { %p413_p3 = scmp.lt.u32.totalorder %s409_s23, %s666_s2 }
  0x29   :  { %p415_p4 = pnand %p413_p3, %p410_p2 }
  0x2b   :  { %418 = shalt.err (!%p415_p4)
}
  0x2c   :  { %s419_s28 = scalar_lea.vmem %s46_s19, 4096  ;;  %p424_p6 = scmp.lt.s32.totalorder %s46_s19, %s46_s19 }
  0x2d   :  { %p420_p5 = scmp.ne.s32.totalorder %s46_s19, %s419_s28  ;;  %p425_p7 = scmp.lt.s32.totalorder %s419_s28, %s419_s28 }
  0x2f   :  { %p426_p8 = por %p425_p7, %p424_p6 }
  0x31   :  { %p427_p9 = pnand %p426_p8, %p420_p5 }
  0x33   :  { %430 = shalt.err (!%p427_p9)
}
  0x34   :  { %s512_s0 = smov 256   ;;  %s513_s21 = smov 16  }
  0x35   :  { %51 = dma.hbm_to_vmem [thread:$0]  %s666_s2, 4096, %s46_s19, [#allocation6], %s512_s0, %s512_s0, %s513_s21  }
  0x36   :  { %s514_s8 = smov [#allocation8]   ;;  %s431_s12 = scalar_lea.hbm %s667_s3, 32 }
  0x37   :  { %s58_s9 = sshll.u32 %s514_s8, 4  ;;  %p432_p10 = scmp.ne.s32.totalorder %s667_s3, %s431_s12  ;;  %s59_s9 = int_to_ptr.vmem [resolvable:$true] %s58_s9 }
  0x38   :  { %p435_p11 = scmp.lt.u32.totalorder %s431_s12, %s667_s3 }
  0x3a   :  { %p437_p12 = pnand %p435_p11, %p432_p10 }
  0x3c   :  { %440 = shalt.err (!%p437_p12)
}
  0x3d   :  { %s441_s1 = scalar_lea.vmem %s59_s9, 32  ;;  %p446_p0 = scmp.lt.s32.totalorder %s59_s9, %s59_s9 }
  0x3e   :  { %p442_p13 = scmp.ne.s32.totalorder %s59_s9, %s441_s1  ;;  %p447_p1 = scmp.lt.s32.totalorder %s441_s1, %s441_s1 }
  0x40   :  { %p448_p2 = por %p447_p1, %p446_p0 }
  0x42   :  { %p449_p3 = pnand %p448_p2, %p442_p13 }
  0x44   :  { %452 = shalt.err (!%p449_p3)
}
  0x45   :  { %61 = dma.hbm_to_vmem [thread:$0]  %s667_s3, 32, %s59_s9, [#allocation9]  }
  0x46   :  { %497 = dma.done.wait [#allocation3], 1024  }
  0x47   :  { %498 = vsyncadd [#allocation3], 4294966272 }
  0x48   :  { %499 = dma.done.wait [#allocation6], 5120  }
  0x49   :  { %500 = vsyncadd [#allocation6], 4294962176 }
  0x4a   :  { %501 = dma.done.wait [#allocation9], 32  }
  0x4b   :  { %502 = vsyncadd [#allocation9], 4294967264  ;;  %v515_v0 = vmov 0.0   ;;  %v83_v1 = vld [vmem:[#allocation7 + $0x8] sm:$0xff]  ;;  %v85_v2 = vld [vmem:[#allocation7 + $0x18] sm:$0xff]  ;;  %v116_v57 = vlaneseq  ;;  %s516_s3 = smov [#allocation10]  }
  0x4c   :  { %190 = vmatprep.mubr.f32.mxu0 %v515_v0  ;;  %214 = vmatprep.mubr.f32.mxu1 %v515_v0  ;;  %v82_v3 = vld [vmem:[#allocation7] sm:$0xff]  ;;  %v306_v4 = vpack.c.bf16 %v85_v2, %v83_v1  ;;  %v84_v5 = vld [vmem:[#allocation7 + $0x10] sm:$0xff]  ;;  %v87_v6 = vld [vmem:[#allocation7 + $0x28] sm:$0xff]  ;;  %s276_s18 = sshll.u32 %s516_s3, 4  ;;  %s517_s19 = smov [#allocation11]   ;;  %s277_s18 = int_to_ptr.vmem [resolvable:$true] %s276_s18 }
  0x4d   :  { %v89_v7 = vld [vmem:[#allocation7 + $0x38] sm:$0xff]  ;;  %v308_v8 = vpack.c.bf16 %v84_v5, %v82_v3  ;;  %v86_v10 = vld [vmem:[#allocation7 + $0x20] sm:$0xff]  ;;  %v88_v11 = vld [vmem:[#allocation7 + $0x30] sm:$0xff]  ;;  %v117_v58 = vshrl.u32 %v116_v57, 7  ;;  %s288_s20 = sshll.u32 %s517_s19, 4  ;;  %s453_s22 = scalar_lea.vmem %s277_s18, 1024  ;;  %s627_s20 = int_to_ptr.vmem [resolvable:$true] %s288_s20 }
  0x4e   :  { %v310_v9 = vpack.c.bf16 %v89_v7, %v87_v6  ;;  %v91_v12 = vld [vmem:[#allocation7 + $0x48] sm:$0xff]  ;;  %307 = vmatprep.subr.bf16.mxu0 %v306_v4  ;;  %338 = vmatprep.subr.bf16.mxu1 %v306_v4  ;;  %v93_v13 = vld [vmem:[#allocation7 + $0x58] sm:$0xff]  ;;  %v312_v14 = vpack.c.bf16 %v88_v11, %v86_v10  ;;  %v90_v16 = vld [vmem:[#allocation7 + $0x40] sm:$0xff]  ;;  %p454_p4 = scmp.ne.s32.totalorder %s277_s18, %s453_s22  ;;  %p458_p5 = scmp.lt.s32.totalorder %s277_s18, %s277_s18 }
  0x4f   :  { %309 = vmatpush1.bf16.msra.mxu0 %v308_v8  ;;  %346 = vmatpush1.bf16.msra.mxu1 %v308_v8  ;;  %v314_v15 = vpack.c.bf16 %v93_v13, %v91_v12  ;;  %v92_v17 = vld [vmem:[#allocation7 + $0x50] sm:$0xff]  ;;  %v95_v18 = vld [vmem:[#allocation7 + $0x68] sm:$0xff]  ;;  %v97_v19 = vld [vmem:[#allocation7 + $0x78] sm:$0xff]  ;;  %v118_v59 = vsub.s32 0, %v117_v58  ;;  %v122_v61 = vsub.s32 1, %v117_v58  ;;  %p459_p6 = scmp.lt.s32.totalorder %s453_s22, %s453_s22 }
  0x50   :  { %311 = vmatprep.subr.bf16.mxu0 %v310_v9  ;;  %339 = vmatprep.subr.bf16.mxu1 %v310_v9  ;;  %v316_v20 = vpack.c.bf16 %v92_v17, %v90_v16  ;;  %v318_v21 = vpack.c.bf16 %v97_v19, %v95_v18  ;;  %v94_v22 = vld [vmem:[#allocation7 + $0x60] sm:$0xff]  ;;  %v96_v23 = vld [vmem:[#allocation7 + $0x70] sm:$0xff]  ;;  %v99_v24 = vld [vmem:[#allocation7 + $0x88] sm:$0xff] }
  0x51   :  { %v101_v25 = vld [vmem:[#allocation7 + $0x98] sm:$0xff]  ;;  %v320_v26 = vpack.c.bf16 %v96_v23, %v94_v22  ;;  %v98_v28 = vld [vmem:[#allocation7 + $0x80] sm:$0xff]  ;;  %v100_v29 = vld [vmem:[#allocation7 + $0x90] sm:$0xff]  ;;  %p460_p7 = por %p459_p6, %p458_p5 }
  0x52   :  { %v322_v27 = vpack.c.bf16 %v101_v25, %v99_v24  ;;  %v103_v30 = vld [vmem:[#allocation7 + $0xa8] sm:$0xff]  ;;  %v105_v31 = vld [vmem:[#allocation7 + $0xb8] sm:$0xff]  ;;  %v324_v32 = vpack.c.bf16 %v100_v29, %v98_v28  ;;  %v102_v34 = vld [vmem:[#allocation7 + $0xa0] sm:$0xff] }
  0x53   :  { %313 = vmatpush1.bf16.msra.mxu0 %v312_v14  ;;  %347 = vmatpush1.bf16.msra.mxu1 %v312_v14  ;;  %v326_v33 = vpack.c.bf16 %v105_v31, %v103_v30  ;;  %v104_v35 = vld [vmem:[#allocation7 + $0xb0] sm:$0xff]  ;;  %v107_v36 = vld [vmem:[#allocation7 + $0xc8] sm:$0xff]  ;;  %v109_v37 = vld [vmem:[#allocation7 + $0xd8] sm:$0xff]  ;;  %p461_p8 = pnand %p460_p7, %p454_p4 }
  0x54   :  { %315 = vmatprep.subr.bf16.mxu0 %v314_v15  ;;  %340 = vmatprep.subr.bf16.mxu1 %v314_v15  ;;  %v328_v38 = vpack.c.bf16 %v104_v35, %v102_v34  ;;  %v330_v39 = vpack.c.bf16 %v109_v37, %v107_v36  ;;  %v106_v40 = vld [vmem:[#allocation7 + $0xc0] sm:$0xff]  ;;  %v108_v41 = vld [vmem:[#allocation7 + $0xd0] sm:$0xff]  ;;  %v111_v42 = vld [vmem:[#allocation7 + $0xe8] sm:$0xff] }
  0x55   :  { %v113_v43 = vld [vmem:[#allocation7 + $0xf8] sm:$0xff]  ;;  %v332_v44 = vpack.c.bf16 %v108_v41, %v106_v40  ;;  %v110_v46 = vld [vmem:[#allocation7 + $0xe0] sm:$0xff]  ;;  %v112_v47 = vld [vmem:[#allocation7 + $0xf0] sm:$0xff] }
  0x56   :  { %v334_v45 = vpack.c.bf16 %v113_v43, %v111_v42  ;;  %v336_v48 = vpack.c.bf16 %v112_v47, %v110_v46  ;;  %v74_v49 = vld [vmem:[#allocation2] sm:$0xff]  ;;  %v75_v51 = vld [vmem:[#allocation2 + $0x8] sm:$0xff]  ;;  %v76_v53 = vld [vmem:[#allocation2 + $0x10] sm:$0xff] }
  0x57   :  { %317 = vmatpush1.bf16.msra.mxu0 %v316_v20  ;;  %348 = vmatpush1.bf16.msra.mxu1 %v316_v20  ;;  %v78_v50 = vld [vmem:[#allocation2 + $0x20] sm:$0xff]  ;;  %v79_v52 = vld [vmem:[#allocation2 + $0x28] sm:$0xff]  ;;  %v80_v54 = vld [vmem:[#allocation2 + $0x30] sm:$0xff] }
  0x58   :  { %319 = vmatprep.subr.bf16.mxu0 %v318_v21  ;;  %341 = vmatprep.subr.bf16.mxu1 %v318_v21  ;;  %v77_v55 = vld [vmem:[#allocation2 + $0x18] sm:$0xff]  ;;  %v114_v60 = vld [vmem:[#allocation8] sm:$0x3]  ;;  %v248_v17 = vld [vmem:[#allocation5 + $0x8] sm:$0xff] }
  0x59   :  { %v81_v56 = vld [vmem:[#allocation2 + $0x38] sm:$0xff]  ;;  %v119_v62 = vrot.slane %v114_v60, %v118_v59  ;;  %v617_v63 = vrot.slane %v114_v60, %v122_v61  ;;  %v247_v6 = vld [vmem:[#allocation5] sm:$0xff]  ;;  %v252_v19 = vld [vmem:[#allocation5 + $0x28] sm:$0xff] }
  0x5a   :  { %v249_v29 = vld [vmem:[#allocation5 + $0x10] sm:$0xff]  ;;  %v250_v41 = vld [vmem:[#allocation5 + $0x18] sm:$0xff] }
  0x5b   :  { %321 = vmatpush1.bf16.msra.mxu0 %v320_v26  ;;  %349 = vmatpush1.bf16.msra.mxu1 %v320_v26  ;;  %v253_v31 = vld [vmem:[#allocation5 + $0x30] sm:$0xff]  ;;  %v254_v43 = vld [vmem:[#allocation5 + $0x38] sm:$0xff] }
  0x5c   :  { %323 = vmatprep.subr.bf16.mxu0 %v322_v27  ;;  %342 = vmatprep.subr.bf16.mxu1 %v322_v27 }
  0x5f   :  { %325 = vmatpush1.bf16.msra.mxu0 %v324_v32  ;;  %350 = vmatpush1.bf16.msra.mxu1 %v324_v32 }
  0x60   :  { %327 = vmatprep.subr.bf16.mxu0 %v326_v33  ;;  %343 = vmatprep.subr.bf16.mxu1 %v326_v33 }
  0x63   :  { %329 = vmatpush1.bf16.msra.mxu0 %v328_v38  ;;  %351 = vmatpush1.bf16.msra.mxu1 %v328_v38 }
  0x64   :  { %331 = vmatprep.subr.bf16.mxu0 %v330_v39  ;;  %344 = vmatprep.subr.bf16.mxu1 %v330_v39 }
  0x67   :  { %333 = vmatpush1.bf16.msra.mxu0 %v332_v44  ;;  %352 = vmatpush1.bf16.msra.mxu1 %v332_v44 }
  0x68   :  { %335 = vmatprep.subr.bf16.mxu0 %v334_v45  ;;  %345 = vmatprep.subr.bf16.mxu1 %v334_v45 }
  0x6b   :  { %337 = vmatpush1.bf16.msra.mxu0 %v336_v48  ;;  %353 = vmatpush1.bf16.msra.mxu1 %v336_v48 }
  0x6e   :  { %191 = vmatmul.mubr.f32.vlgmr.msra.gmra.mrb[0].mxu0 %v74_v49  ;;  %215 = vmatmul.mubr.f32.vlgmr.msra.gmra.mrb[0].mxu1 %v78_v50 }
  0x6f   :  { %196 = vmatprep.mubr.f32.mxu0 %v515_v0  ;;  %220 = vmatprep.mubr.f32.mxu1 %v515_v0 }
  0x72   :  { %197 = vmatmul.mubr.f32.gmra.mrb[2].mxu0 %v75_v51  ;;  %221 = vmatmul.mubr.f32.gmra.mrb[2].mxu1 %v79_v52 }
  0x73   :  { %202 = vmatprep.mubr.f32.mxu0 %v515_v0  ;;  %226 = vmatprep.mubr.f32.mxu1 %v515_v0 }
  0x76   :  { %203 = vmatmul.mubr.f32.gmra.mrb[4].mxu0 %v76_v53  ;;  %227 = vmatmul.mubr.f32.gmra.mrb[4].mxu1 %v80_v54 }
  0x77   :  { %208 = vmatprep.mubr.f32.mxu0 %v515_v0  ;;  %232 = vmatprep.mubr.f32.mxu1 %v515_v0  ;;  %v251_v0 = vld [vmem:[#allocation5 + $0x20] sm:$0xff] }
  0x7a   :  { %209 = vmatmul.mubr.f32.gmra.mrb[6].mxu0 %v77_v55  ;;  %233 = vmatmul.mubr.f32.gmra.mrb[6].mxu1 %v81_v56 }
 0x141   :  { %v192_v1 = vpop.f32.mrb[0].mxu0  ;;  %v216_v2 = vpop.f32.mrb[0].mxu1 }
 0x142   :  { %v193_v3 = vadd.f32 %v192_v1, %v119_v62  ;;  %v217_v4 = vadd.f32 %v216_v2, %v119_v62  ;;  %v194_v5 = vpop.f32.mrb[1].mxu0  ;;  %v218_v7 = vpop.f32.mrb[1].mxu1 }
 0x143   :  { %v195_v8 = vadd.f32 %v194_v5, %v617_v63  ;;  %v219_v9 = vadd.f32 %v218_v7, %v617_v63 }
 0x144   :  { %239 = vst [vmem:[#allocation10] sm:$0xff] %v193_v3  ;;  %243 = vst [vmem:[#allocation10 + $0x20] sm:$0xff] %v217_v4 }
 0x145   :  { %v255_v10 = vadd.f32 %v247_v6, %v195_v8  ;;  %v259_v11 = vadd.f32 %v251_v0, %v219_v9  ;;  %v198_v12 = vpop.f32.mrb[2].mxu0  ;;  %v222_v13 = vpop.f32.mrb[2].mxu1 }
 0x146   :  { %v199_v14 = vadd.f32 %v198_v12, %v119_v62  ;;  %v223_v15 = vadd.f32 %v222_v13, %v119_v62  ;;  %v200_v16 = vpop.f32.mrb[3].mxu0  ;;  %v224_v18 = vpop.f32.mrb[3].mxu1 }
 0x147   :  { %263 = vst [vmem:[#allocation11] sm:$0xff] %v255_v10  ;;  %267 = vst [vmem:[#allocation11 + $0x20] sm:$0xff] %v259_v11  ;;  %v201_v20 = vadd.f32 %v200_v16, %v617_v63  ;;  %v225_v21 = vadd.f32 %v224_v18, %v617_v63 }
 0x148   :  { %240 = vst [vmem:[#allocation10 + $0x8] sm:$0xff] %v199_v14  ;;  %244 = vst [vmem:[#allocation10 + $0x28] sm:$0xff] %v223_v15 }
 0x149   :  { %v256_v22 = vadd.f32 %v248_v17, %v201_v20  ;;  %v260_v23 = vadd.f32 %v252_v19, %v225_v21  ;;  %v204_v24 = vpop.f32.mrb[4].mxu0  ;;  %v228_v25 = vpop.f32.mrb[4].mxu1 }
 0x14a   :  { %v205_v26 = vadd.f32 %v204_v24, %v119_v62  ;;  %v229_v27 = vadd.f32 %v228_v25, %v119_v62  ;;  %v206_v28 = vpop.f32.mrb[5].mxu0  ;;  %v230_v30 = vpop.f32.mrb[5].mxu1 }
 0x14b   :  { %264 = vst [vmem:[#allocation11 + $0x8] sm:$0xff] %v256_v22  ;;  %268 = vst [vmem:[#allocation11 + $0x28] sm:$0xff] %v260_v23  ;;  %v207_v32 = vadd.f32 %v206_v28, %v617_v63  ;;  %v231_v33 = vadd.f32 %v230_v30, %v617_v63 }
 0x14c   :  { %241 = vst [vmem:[#allocation10 + $0x10] sm:$0xff] %v205_v26  ;;  %245 = vst [vmem:[#allocation10 + $0x30] sm:$0xff] %v229_v27 }
 0x14d   :  { %v257_v34 = vadd.f32 %v249_v29, %v207_v32  ;;  %v261_v35 = vadd.f32 %v253_v31, %v231_v33  ;;  %v210_v36 = vpop.f32.mrb[6].mxu0  ;;  %v234_v37 = vpop.f32.mrb[6].mxu1 }
 0x14e   :  { %v211_v38 = vadd.f32 %v210_v36, %v119_v62  ;;  %v235_v39 = vadd.f32 %v234_v37, %v119_v62  ;;  %v212_v40 = vpop.f32.mrb[7].mxu0  ;;  %v236_v42 = vpop.f32.mrb[7].mxu1 }
 0x14f   :  { %265 = vst [vmem:[#allocation11 + $0x10] sm:$0xff] %v257_v34  ;;  %269 = vst [vmem:[#allocation11 + $0x30] sm:$0xff] %v261_v35  ;;  %v213_v44 = vadd.f32 %v212_v40, %v617_v63  ;;  %v237_v45 = vadd.f32 %v236_v42, %v617_v63 }
 0x150   :  { %242 = vst [vmem:[#allocation10 + $0x18] sm:$0xff] %v211_v38  ;;  %246 = vst [vmem:[#allocation10 + $0x38] sm:$0xff] %v235_v39 }
 0x151   :  { %v258_v46 = vadd.f32 %v250_v41, %v213_v44  ;;  %v262_v47 = vadd.f32 %v254_v43, %v237_v45 }
 0x152   :  { %464 = shalt.err (!%p461_p8)
}
 0x153   :  { %s465_s25 = scalar_lea.hbm %s668_s4, 1024 }
 0x154   :  { %p466_p9 = scmp.ne.s32.totalorder %s668_s4, %s465_s25  ;;  %p469_p10 = scmp.lt.u32.totalorder %s465_s25, %s668_s4 }
 0x156   :  { %p471_p11 = pnand %p469_p10, %p466_p9 }
 0x158   :  { %474 = shalt.err (!%p471_p11)
}
 0x159   :  { %282 = dma.vmem_to_hbm [thread:$0]  %s277_s18, 1024, %s668_s4, [#allocation4], %s509_s30, %s509_s30, %s510_s6   ;;  %266 = vst [vmem:[#allocation11 + $0x18] sm:$0xff] %v258_v46  ;;  %270 = vst [vmem:[#allocation11 + $0x38] sm:$0xff] %v262_v47 }
 0x15a   :  { %s475_s7 = scalar_lea.vmem %s627_s20, 1024  ;;  %p480_p13 = scmp.lt.s32.totalorder %s627_s20, %s627_s20 }
 0x15b   :  { %p476_p12 = scmp.ne.s32.totalorder %s627_s20, %s475_s7  ;;  %p481_p0 = scmp.lt.s32.totalorder %s475_s7, %s475_s7 }
 0x15d   :  { %p482_p1 = por %p481_p0, %p480_p13 }
 0x15f   :  { %p483_p2 = pnand %p482_p1, %p476_p12 }
 0x161   :  { %486 = shalt.err (!%p483_p2)
}
 0x162   :  { %s487_s10 = scalar_lea.hbm %s669_s5, 1024 }
 0x163   :  { %p488_p3 = scmp.ne.s32.totalorder %s669_s5, %s487_s10  ;;  %p491_p4 = scmp.lt.u32.totalorder %s487_s10, %s669_s5 }
 0x165   :  { %p493_p5 = pnand %p491_p4, %p488_p3 }
 0x167   :  { %496 = shalt.err (!%p493_p5)
}
 0x168   :  { %294 = dma.vmem_to_hbm [thread:$0]  %s627_s20, 1024, %s669_s5, [#allocation12], %s509_s30, %s509_s30, %s510_s6  }
 0x169   :  { %503 = dma.done.wait [#allocation4], 1024  }
 0x16a   :  { %504 = vsyncadd [#allocation4], 4294966272 }
 0x16b   :  { %505 = dma.done.wait [#allocation12], 1024  }
 0x16c   :  { %506 = vsyncadd [#allocation12], 4294966272 }
 0x16d   :  { %301 = vsyncpa [#allocation3], 1 }
 0x16e   :  { %302 = vsyncpa [#allocation6], 1 }
 0x16f   :  { %303 = vsyncpa [#allocation9], 1 }
 0x170   :  { %304 = vsyncpa [#allocation4], 1 }
 0x171   :  { %305 = vsyncpa [#allocation12], 1 }

// kernel: rssm_sequence.3
= control target key start
LH: loop header
LB: loop body
LE: loop exit
PB: predicated region body
PF: predicated region fallthrough
CT: control target
= control target key end

     0   :  { %10 = vsyncpa [#allocation3], 0  ;;  %s803_s0 = inlined_call_operand.hbm [shape: f32[64,128], index: 0, kind: input, shape index: {}]   ;;  %s804_s1 = inlined_call_operand.hbm [shape: f32[128,512], index: 1, kind: input, shape index: {}]   ;;  %s805_s2 = inlined_call_operand.hbm [shape: f32[1,512], index: 2, kind: input, shape index: {}]   ;;  %s806_s3 = inlined_call_operand.hbm [shape: f32[64,384], index: 3, kind: output, shape index: {0}]   ;;  %s807_s4 = inlined_call_operand.hbm [shape: f32[64,128], index: 4, kind: output, shape index: {1}]  }
   0x1   :  { %11 = vsyncpa [#allocation6], 0 }
   0x2   :  { %12 = vsyncpa [#allocation4], 0 }
   0x3   :  { %13 = vsyncpa [#allocation10], 0  ;;  %s637_s15 = smov [#allocation5]   ;;  %s519_s19 = scalar_lea.hbm %s804_s1, 8192 }
   0x4   :  { %s31_s16 = sshll.u32 %s637_s15, 4  ;;  %p520_p0 = scmp.ne.s32.totalorder %s804_s1, %s519_s19  ;;  %s32_s16 = int_to_ptr.vmem [resolvable:$true] %s31_s16 }
   0x5   :  { %p523_p1 = scmp.lt.u32.totalorder %s519_s19, %s804_s1 }
   0x7   :  { %p525_p2 = pnand %p523_p1, %p520_p0 }
   0x9   :  { %528 = shalt.err (!%p525_p2)
}
   0xa   :  { %s529_s24 = scalar_lea.vmem %s32_s16, 8192  ;;  %p534_p4 = scmp.lt.s32.totalorder %s32_s16, %s32_s16 }
   0xb   :  { %p530_p3 = scmp.ne.s32.totalorder %s32_s16, %s529_s24  ;;  %p535_p5 = scmp.lt.s32.totalorder %s529_s24, %s529_s24 }
   0xd   :  { %p536_p6 = por %p535_p5, %p534_p4 }
   0xf   :  { %p537_p7 = pnand %p536_p6, %p530_p3 }
  0x11   :  { %540 = shalt.err (!%p537_p7)
}
  0x12   :  { %s638_s25 = smov 512   ;;  %s639_s26 = smov 32  }
  0x13   :  { %37 = dma.hbm_to_vmem [thread:$0]  %s804_s1, 8192, %s32_s16, [#allocation6], %s638_s25, %s638_s25, %s639_s26  }
  0x14   :  { %s640_s29 = smov [#allocation2]   ;;  %s541_s7 = scalar_lea.hbm %s803_s0, 1024 }
  0x15   :  { %s19_s30 = sshll.u32 %s640_s29, 4  ;;  %p542_p8 = scmp.ne.s32.totalorder %s803_s0, %s541_s7  ;;  %s20_s30 = int_to_ptr.vmem [resolvable:$true] %s19_s30 }
  0x16   :  { %p545_p9 = scmp.lt.u32.totalorder %s541_s7, %s803_s0 }
  0x18   :  { %p547_p10 = pnand %p545_p9, %p542_p8 }
  0x1a   :  { %550 = shalt.err (!%p547_p10)
}
  0x1b   :  { %s551_s12 = scalar_lea.vmem %s20_s30, 1024  ;;  %p556_p12 = scmp.lt.s32.totalorder %s20_s30, %s20_s30 }
  0x1c   :  { %p552_p11 = scmp.ne.s32.totalorder %s20_s30, %s551_s12  ;;  %p557_p13 = scmp.lt.s32.totalorder %s551_s12, %s551_s12 }
  0x1e   :  { %p558_p0 = por %p557_p13, %p556_p12 }
  0x20   :  { %p559_p1 = pnand %p558_p0, %p552_p11 }
  0x22   :  { %562 = shalt.err (!%p559_p1)
}
  0x23   :  { %s641_s1 = smov 128   ;;  %s642_s13 = smov 8  }
  0x24   :  { %25 = dma.hbm_to_vmem [thread:$0]  %s803_s0, 1024, %s20_s30, [#allocation3], %s641_s1, %s641_s1, %s642_s13  }
  0x25   :  { %s643_s16 = smov [#allocation7]   ;;  %s563_s20 = scalar_lea.hbm %s805_s2, 64 }
  0x26   :  { %s44_s17 = sshll.u32 %s643_s16, 4  ;;  %p564_p2 = scmp.ne.s32.totalorder %s805_s2, %s563_s20  ;;  %s45_s17 = int_to_ptr.vmem [resolvable:$true] %s44_s17 }
  0x27   :  { %p567_p3 = scmp.lt.u32.totalorder %s563_s20, %s805_s2 }
  0x29   :  { %p569_p4 = pnand %p567_p3, %p564_p2 }
  0x2b   :  { %572 = shalt.err (!%p569_p4)
}
  0x2c   :  { %s573_s25 = scalar_lea.vmem %s45_s17, 64  ;;  %p578_p6 = scmp.lt.s32.totalorder %s45_s17, %s45_s17 }
  0x2d   :  { %p574_p5 = scmp.ne.s32.totalorder %s45_s17, %s573_s25  ;;  %p579_p7 = scmp.lt.s32.totalorder %s573_s25, %s573_s25 }
  0x2f   :  { %p580_p8 = por %p579_p7, %p578_p6 }
  0x31   :  { %p581_p9 = pnand %p580_p8, %p574_p5 }
  0x33   :  { %584 = shalt.err (!%p581_p9)
}
  0x34   :  { %47 = dma.hbm_to_vmem [thread:$0]  %s805_s2, 64, %s45_s17, [#allocation6]  }
  0x35   :  { %629 = dma.done.wait [#allocation3], 1024  }
  0x36   :  { %630 = vsyncadd [#allocation3], 4294966272 }
  0x37   :  { %631 = dma.done.wait [#allocation6], 8256  }
  0x38   :  { %632 = vsyncadd [#allocation6], 4294959040  ;;  %v644_v0 = vmov 0.0   ;;  %v66_v1 = vld [vmem:[#allocation5 + $0x8] sm:$0xff]  ;;  %v68_v3 = vld [vmem:[#allocation5 + $0x18] sm:$0xff]  ;;  %s645_s2 = smov [#allocation8]  }
  0x39   :  { %215 = vmatprep.mubr.f32.mxu0 %v644_v0  ;;  %328 = vmatprep.mubr.f32.mxu1 %v644_v0  ;;  %v70_v2 = vld [vmem:[#allocation5 + $0x28] sm:$0xff]  ;;  %v72_v5 = vld [vmem:[#allocation5 + $0x38] sm:$0xff]  ;;  %v65_v6 = vld [vmem:[#allocation5] sm:$0xff]  ;;  %s414_s27 = sshll.u32 %s645_s2, 4  ;;  %s646_s28 = smov [#allocation9]   ;;  %s415_s27 = int_to_ptr.vmem [resolvable:$true] %s414_s27 }
  0x3a   :  { %v443_v4 = vpack.c.bf16 %v70_v2, %v66_v1  ;;  %v69_v7 = vld [vmem:[#allocation5 + $0x20] sm:$0xff]  ;;  %v475_v8 = vpack.c.bf16 %v72_v5, %v68_v3  ;;  %v67_v10 = vld [vmem:[#allocation5 + $0x10] sm:$0xff]  ;;  %v74_v12 = vld [vmem:[#allocation5 + $0x48] sm:$0xff]  ;;  %s426_s29 = sshll.u32 %s646_s28, 4  ;;  %s585_s30 = scalar_lea.vmem %s415_s27, 3072  ;;  %s769_s29 = int_to_ptr.vmem [resolvable:$true] %s426_s29 }
  0x3b   :  { %v445_v9 = vpack.c.bf16 %v69_v7, %v65_v6  ;;  %v71_v11 = vld [vmem:[#allocation5 + $0x30] sm:$0xff]  ;;  %v78_v14 = vld [vmem:[#allocation5 + $0x68] sm:$0xff]  ;;  %v76_v15 = vld [vmem:[#allocation5 + $0x58] sm:$0xff]  ;;  %p586_p10 = scmp.ne.s32.totalorder %s415_s27, %s585_s30  ;;  %p590_p11 = scmp.lt.s32.totalorder %s415_s27, %s415_s27 }
  0x3c   :  { %444 = vmatprep.subr.bf16.mxu0 %v443_v4  ;;  %v477_v13 = vpack.c.bf16 %v71_v11, %v67_v10  ;;  %v80_v16 = vld [vmem:[#allocation5 + $0x78] sm:$0xff]  ;;  %476 = vmatprep.subr.bf16.mxu1 %v475_v8  ;;  %v447_v17 = vpack.c.bf16 %v78_v14, %v74_v12  ;;  %v73_v19 = vld [vmem:[#allocation5 + $0x40] sm:$0xff]  ;;  %v75_v21 = vld [vmem:[#allocation5 + $0x50] sm:$0xff]  ;;  %p591_p12 = scmp.lt.s32.totalorder %s585_s30, %s585_s30 }
  0x3d   :  { %446 = vmatpush1.bf16.msra.mxu0 %v445_v9  ;;  %v479_v18 = vpack.c.bf16 %v80_v16, %v76_v15  ;;  %v77_v20 = vld [vmem:[#allocation5 + $0x60] sm:$0xff]  ;;  %v79_v23 = vld [vmem:[#allocation5 + $0x70] sm:$0xff]  ;;  %v82_v24 = vld [vmem:[#allocation5 + $0x88] sm:$0xff] }
  0x3e   :  { %478 = vmatpush1.bf16.msra.mxu1 %v477_v13  ;;  %v449_v22 = vpack.c.bf16 %v77_v20, %v73_v19  ;;  %v86_v25 = vld [vmem:[#allocation5 + $0xa8] sm:$0xff]  ;;  %448 = vmatprep.subr.bf16.mxu0 %v447_v17  ;;  %v481_v26 = vpack.c.bf16 %v79_v23, %v75_v21  ;;  %v84_v28 = vld [vmem:[#allocation5 + $0x98] sm:$0xff]  ;;  %v81_v30 = vld [vmem:[#allocation5 + $0x80] sm:$0xff]  ;;  %p592_p13 = por %p591_p12, %p590_p11 }
  0x3f   :  { %480 = vmatprep.subr.bf16.mxu1 %v479_v18  ;;  %v451_v27 = vpack.c.bf16 %v86_v25, %v82_v24  ;;  %v88_v29 = vld [vmem:[#allocation5 + $0xb8] sm:$0xff]  ;;  %v85_v32 = vld [vmem:[#allocation5 + $0xa0] sm:$0xff]  ;;  %v83_v33 = vld [vmem:[#allocation5 + $0x90] sm:$0xff] }
  0x40   :  { %v483_v31 = vpack.c.bf16 %v88_v29, %v84_v28  ;;  %v87_v34 = vld [vmem:[#allocation5 + $0xb0] sm:$0xff]  ;;  %v453_v35 = vpack.c.bf16 %v85_v32, %v81_v30  ;;  %v90_v36 = vld [vmem:[#allocation5 + $0xc8] sm:$0xff]  ;;  %v92_v38 = vld [vmem:[#allocation5 + $0xd8] sm:$0xff]  ;;  %p593_p0 = pnand %p592_p13, %p586_p10 }
  0x41   :  { %450 = vmatpush1.bf16.msra.mxu0 %v449_v22  ;;  %v94_v37 = vld [vmem:[#allocation5 + $0xe8] sm:$0xff]  ;;  %v485_v39 = vpack.c.bf16 %v87_v34, %v83_v33  ;;  %v96_v41 = vld [vmem:[#allocation5 + $0xf8] sm:$0xff]  ;;  %v89_v42 = vld [vmem:[#allocation5 + $0xc0] sm:$0xff] }
  0x42   :  { %482 = vmatpush1.bf16.msra.mxu1 %v481_v26  ;;  %452 = vmatprep.subr.bf16.mxu0 %v451_v27  ;;  %v455_v40 = vpack.c.bf16 %v94_v37, %v90_v36  ;;  %v93_v43 = vld [vmem:[#allocation5 + $0xe0] sm:$0xff]  ;;  %v487_v44 = vpack.c.bf16 %v96_v41, %v92_v38  ;;  %v91_v45 = vld [vmem:[#allocation5 + $0xd0] sm:$0xff]  ;;  %v98_v47 = vld [vmem:[#allocation5 + $0x108] sm:$0xff] }
  0x43   :  { %484 = vmatprep.subr.bf16.mxu1 %v483_v31  ;;  %v95_v46 = vld [vmem:[#allocation5 + $0xf0] sm:$0xff]  ;;  %v102_v48 = vld [vmem:[#allocation5 + $0x128] sm:$0xff]  ;;  %v100_v49 = vld [vmem:[#allocation5 + $0x118] sm:$0xff]  ;;  %v457_v51 = vpack.c.bf16 %v93_v43, %v89_v42  ;;  %v131_v42 = vlaneseq }
  0x44   :  { %v104_v50 = vld [vmem:[#allocation5 + $0x138] sm:$0xff]  ;;  %v489_v52 = vpack.c.bf16 %v95_v46, %v91_v45  ;;  %v459_v53 = vpack.c.bf16 %v102_v48, %v98_v47  ;;  %v97_v54 = vld [vmem:[#allocation5 + $0x100] sm:$0xff]  ;;  %v99_v56 = vld [vmem:[#allocation5 + $0x110] sm:$0xff] }
  0x45   :  { %454 = vmatpush1.bf16.msra.mxu0 %v453_v35  ;;  %v101_v55 = vld [vmem:[#allocation5 + $0x120] sm:$0xff]  ;;  %v491_v57 = vpack.c.bf16 %v104_v50, %v100_v49  ;;  %v103_v58 = vld [vmem:[#allocation5 + $0x130] sm:$0xff]  ;;  %v106_v59 = vld [vmem:[#allocation5 + $0x148] sm:$0xff]  ;;  %v132_v43 = vshrl.u32 %v131_v42, 7 }
  0x46   :  { %486 = vmatpush1.bf16.msra.mxu1 %v485_v39  ;;  %456 = vmatprep.subr.bf16.mxu0 %v455_v40  ;;  %v110_v60 = vld [vmem:[#allocation5 + $0x168] sm:$0xff]  ;;  %v108_v61 = vld [vmem:[#allocation5 + $0x158] sm:$0xff]  ;;  %v461_v63 = vpack.c.bf16 %v101_v55, %v97_v54  ;;  %v493_v1 = vpack.c.bf16 %v103_v58, %v99_v56  ;;  %v105_v3 = vld [vmem:[#allocation5 + $0x140] sm:$0xff] }
  0x47   :  { %488 = vmatprep.subr.bf16.mxu1 %v487_v44  ;;  %v112_v62 = vld [vmem:[#allocation5 + $0x178] sm:$0xff]  ;;  %v463_v2 = vpack.c.bf16 %v110_v60, %v106_v59  ;;  %v109_v4 = vld [vmem:[#allocation5 + $0x160] sm:$0xff]  ;;  %v107_v5 = vld [vmem:[#allocation5 + $0x150] sm:$0xff]  ;;  %v133_v44 = vsub.s32 0, %v132_v43  ;;  %v141_v46 = vsub.s32 2, %v132_v43  ;;  %v137_v47 = vsub.s32 1, %v132_v43 }
  0x48   :  { %v495_v6 = vpack.c.bf16 %v112_v62, %v108_v61  ;;  %v111_v7 = vld [vmem:[#allocation5 + $0x170] sm:$0xff]  ;;  %v114_v8 = vld [vmem:[#allocation5 + $0x188] sm:$0xff]  ;;  %v116_v10 = vld [vmem:[#allocation5 + $0x198] sm:$0xff]  ;;  %v465_v12 = vpack.c.bf16 %v109_v4, %v105_v3  ;;  %v145_v48 = vsub.s32 3, %v132_v43 }
  0x49   :  { %458 = vmatpush1.bf16.msra.mxu0 %v457_v51  ;;  %v118_v9 = vld [vmem:[#allocation5 + $0x1a8] sm:$0xff]  ;;  %v120_v11 = vld [vmem:[#allocation5 + $0x1b8] sm:$0xff]  ;;  %v497_v13 = vpack.c.bf16 %v111_v7, %v107_v5  ;;  %v113_v15 = vld [vmem:[#allocation5 + $0x180] sm:$0xff] }
  0x4a   :  { %490 = vmatpush1.bf16.msra.mxu1 %v489_v52  ;;  %460 = vmatprep.subr.bf16.mxu0 %v459_v53  ;;  %v467_v14 = vpack.c.bf16 %v118_v9, %v114_v8  ;;  %v117_v16 = vld [vmem:[#allocation5 + $0x1a0] sm:$0xff]  ;;  %v115_v17 = vld [vmem:[#allocation5 + $0x190] sm:$0xff]  ;;  %v499_v18 = vpack.c.bf16 %v120_v11, %v116_v10  ;;  %v122_v20 = vld [vmem:[#allocation5 + $0x1c8] sm:$0xff] }
  0x4b   :  { %492 = vmatprep.subr.bf16.mxu1 %v491_v57  ;;  %v119_v19 = vld [vmem:[#allocation5 + $0x1b0] sm:$0xff]  ;;  %v126_v21 = vld [vmem:[#allocation5 + $0x1e8] sm:$0xff]  ;;  %v124_v22 = vld [vmem:[#allocation5 + $0x1d8] sm:$0xff]  ;;  %v469_v24 = vpack.c.bf16 %v117_v16, %v113_v15 }
  0x4c   :  { %v128_v23 = vld [vmem:[#allocation5 + $0x1f8] sm:$0xff]  ;;  %v501_v25 = vpack.c.bf16 %v119_v19, %v115_v17  ;;  %v471_v26 = vpack.c.bf16 %v126_v21, %v122_v20  ;;  %v121_v27 = vld [vmem:[#allocation5 + $0x1c0] sm:$0xff]  ;;  %v123_v30 = vld [vmem:[#allocation5 + $0x1d0] sm:$0xff] }
  0x4d   :  { %462 = vmatpush1.bf16.msra.mxu0 %v461_v63  ;;  %v125_v28 = vld [vmem:[#allocation5 + $0x1e0] sm:$0xff]  ;;  %v503_v29 = vpack.c.bf16 %v128_v23, %v124_v22  ;;  %v127_v31 = vld [vmem:[#allocation5 + $0x1f0] sm:$0xff]  ;;  %v58_v35 = vld [vmem:[#allocation2 + $0x8] sm:$0xff] }
  0x4e   :  { %494 = vmatpush1.bf16.msra.mxu1 %v493_v1  ;;  %464 = vmatprep.subr.bf16.mxu0 %v463_v2  ;;  %v473_v32 = vpack.c.bf16 %v125_v28, %v121_v27  ;;  %v505_v33 = vpack.c.bf16 %v127_v31, %v123_v30  ;;  %v57_v34 = vld [vmem:[#allocation2] sm:$0xff]  ;;  %v59_v36 = vld [vmem:[#allocation2 + $0x10] sm:$0xff]  ;;  %v60_v37 = vld [vmem:[#allocation2 + $0x18] sm:$0xff] }
  0x4f   :  { %496 = vmatprep.subr.bf16.mxu1 %v495_v6  ;;  %v61_v38 = vld [vmem:[#allocation2 + $0x20] sm:$0xff]  ;;  %v62_v39 = vld [vmem:[#allocation2 + $0x28] sm:$0xff]  ;;  %v63_v40 = vld [vmem:[#allocation2 + $0x30] sm:$0xff] }
  0x50   :  { %v64_v41 = vld [vmem:[#allocation2 + $0x38] sm:$0xff]  ;;  %v129_v45 = vld [vmem:[#allocation7] sm:$0xf] }
  0x51   :  { %466 = vmatpush1.bf16.msra.mxu0 %v465_v12  ;;  %v729_v49 = vrot.slane %v129_v45, %v133_v44  ;;  %v731_v50 = vrot.slane %v129_v45, %v141_v46  ;;  %v733_v51 = vrot.slane %v129_v45, %v137_v47  ;;  %v735_v52 = vrot.slane %v129_v45, %v145_v48 }
  0x52   :  { %498 = vmatpush1.bf16.msra.mxu1 %v497_v13  ;;  %468 = vmatprep.subr.bf16.mxu0 %v467_v14 }
  0x53   :  { %500 = vmatprep.subr.bf16.mxu1 %v499_v18 }
  0x55   :  { %470 = vmatpush1.bf16.msra.mxu0 %v469_v24 }
  0x56   :  { %502 = vmatpush1.bf16.msra.mxu1 %v501_v25  ;;  %472 = vmatprep.subr.bf16.mxu0 %v471_v26 }
  0x57   :  { %504 = vmatprep.subr.bf16.mxu1 %v503_v29 }
  0x59   :  { %474 = vmatpush1.bf16.msra.mxu0 %v473_v32 }
  0x5a   :  { %506 = vmatpush1.bf16.msra.mxu1 %v505_v33 }
  0x5c   :  { %216 = vmatmul.mubr.f32.vlgmr.msra.gmra.mrb[0].mxu0 %v57_v34 }
  0x5d   :  { %329 = vmatmul.mubr.f32.vlgmr.msra.gmra.mrb[0].mxu1 %v57_v34  ;;  %221 = vmatprep.mubr.f32.mxu0 %v644_v0 }
  0x5e   :  { %334 = vmatprep.mubr.f32.mxu1 %v644_v0 }
  0x60   :  { %222 = vmatmul.mubr.f32.gmra.mrb[2].mxu0 %v58_v35 }
  0x61   :  { %335 = vmatmul.mubr.f32.gmra.mrb[2].mxu1 %v58_v35  ;;  %227 = vmatprep.mubr.f32.mxu0 %v644_v0 }
  0x62   :  { %340 = vmatprep.mubr.f32.mxu1 %v644_v0 }
  0x64   :  { %228 = vmatmul.mubr.f32.gmra.mrb[4].mxu0 %v59_v36 }
  0x65   :  { %341 = vmatmul.mubr.f32.gmra.mrb[4].mxu1 %v59_v36  ;;  %233 = vmatprep.mubr.f32.mxu0 %v644_v0 }
  0x66   :  { %346 = vmatprep.mubr.f32.mxu1 %v644_v0 }
  0x68   :  { %234 = vmatmul.mubr.f32.gmra.mrb[6].mxu0 %v60_v37 }
  0x69   :  { %347 = vmatmul.mubr.f32.gmra.mrb[6].mxu1 %v60_v37  ;;  %239 = vmatprep.mubr.f32.mxu0 %v644_v0 }
  0x6a   :  { %352 = vmatprep.mubr.f32.mxu1 %v644_v0 }
  0x6c   :  { %240 = vmatmul.mubr.f32.gmra.mrb[8].mxu0 %v61_v38 }
  0x6d   :  { %353 = vmatmul.mubr.f32.gmra.mrb[8].mxu1 %v61_v38  ;;  %245 = vmatprep.mubr.f32.mxu0 %v644_v0 }
  0x6e   :  { %358 = vmatprep.mubr.f32.mxu1 %v644_v0 }
  0x70   :  { %246 = vmatmul.mubr.f32.gmra.mrb[10].mxu0 %v62_v39 }
  0x71   :  { %359 = vmatmul.mubr.f32.gmra.mrb[10].mxu1 %v62_v39  ;;  %251 = vmatprep.mubr.f32.mxu0 %v644_v0 }
  0x72   :  { %364 = vmatprep.mubr.f32.mxu1 %v644_v0 }
  0x74   :  { %252 = vmatmul.mubr.f32.gmra.mrb[12].mxu0 %v63_v40 }
  0x75   :  { %365 = vmatmul.mubr.f32.gmra.mrb[12].mxu1 %v63_v40  ;;  %257 = vmatprep.mubr.f32.mxu0 %v644_v0 }
  0x76   :  { %370 = vmatprep.mubr.f32.mxu1 %v644_v0 }
  0x78   :  { %258 = vmatmul.mubr.f32.gmra.mrb[14].mxu0 %v64_v41 }
  0x79   :  { %371 = vmatmul.mubr.f32.gmra.mrb[14].mxu1 %v64_v41 }
 0x12f   :  { %v217_v53 = vpop.f32.mrb[0].mxu0 }
 0x130   :  { %v218_v0 = vadd.f32 %v217_v53, %v729_v49  ;;  %v330_v54 = vpop.f32.mrb[0].mxu1  ;;  %v219_v55 = vpop.f32.mrb[1].mxu0 }
 0x131   :  { %v331_v56 = vadd.f32 %v330_v54, %v731_v50  ;;  %v220_v57 = vadd.f32 %v219_v55, %v733_v51  ;;  %v332_v58 = vpop.f32.mrb[1].mxu1 }
 0x132   :  { %377 = vst [vmem:[#allocation8] sm:$0xff] %v218_v0  ;;  %v333_v59 = vadd.f32 %v332_v58, %v735_v52 }
 0x133   :  { %379 = vst [vmem:[#allocation8 + $0x10] sm:$0xff] %v331_v56  ;;  %378 = vst [vmem:[#allocation8 + $0x8] sm:$0xff] %v220_v57  ;;  %v223_v60 = vpop.f32.mrb[2].mxu0 }
 0x134   :  { %401 = vst [vmem:[#allocation9] sm:$0xff] %v333_v59  ;;  %v224_v61 = vadd.f32 %v223_v60, %v729_v49  ;;  %v336_v62 = vpop.f32.mrb[2].mxu1  ;;  %v225_v63 = vpop.f32.mrb[3].mxu0 }
 0x135   :  { %v337_v1 = vadd.f32 %v336_v62, %v731_v50  ;;  %v226_v2 = vadd.f32 %v225_v63, %v733_v51  ;;  %v338_v3 = vpop.f32.mrb[3].mxu1 }
 0x136   :  { %380 = vst [vmem:[#allocation8 + $0x18] sm:$0xff] %v224_v61  ;;  %v339_v4 = vadd.f32 %v338_v3, %v735_v52 }
 0x137   :  { %382 = vst [vmem:[#allocation8 + $0x28] sm:$0xff] %v337_v1  ;;  %381 = vst [vmem:[#allocation8 + $0x20] sm:$0xff] %v226_v2  ;;  %v229_v5 = vpop.f32.mrb[4].mxu0 }
 0x138   :  { %402 = vst [vmem:[#allocation9 + $0x8] sm:$0xff] %v339_v4  ;;  %v230_v6 = vadd.f32 %v229_v5, %v729_v49  ;;  %v342_v7 = vpop.f32.mrb[4].mxu1  ;;  %v231_v8 = vpop.f32.mrb[5].mxu0 }
 0x139   :  { %v343_v9 = vadd.f32 %v342_v7, %v731_v50  ;;  %v232_v10 = vadd.f32 %v231_v8, %v733_v51  ;;  %v344_v11 = vpop.f32.mrb[5].mxu1 }
 0x13a   :  { %383 = vst [vmem:[#allocation8 + $0x30] sm:$0xff] %v230_v6  ;;  %v345_v12 = vadd.f32 %v344_v11, %v735_v52 }
 0x13b   :  { %385 = vst [vmem:[#allocation8 + $0x40] sm:$0xff] %v343_v9  ;;  %384 = vst [vmem:[#allocation8 + $0x38] sm:$0xff] %v232_v10  ;;  %v235_v13 = vpop.f32.mrb[6].mxu0 }
 0x13c   :  { %403 = vst [vmem:[#allocation9 + $0x10] sm:$0xff] %v345_v12  ;;  %v236_v14 = vadd.f32 %v235_v13, %v729_v49  ;;  %v348_v15 = vpop.f32.mrb[6].mxu1  ;;  %v237_v16 = vpop.f32.mrb[7].mxu0 }
 0x13d   :  { %v349_v17 = vadd.f32 %v348_v15, %v731_v50  ;;  %v238_v18 = vadd.f32 %v237_v16, %v733_v51  ;;  %v350_v19 = vpop.f32.mrb[7].mxu1 }
 0x13e   :  { %386 = vst [vmem:[#allocation8 + $0x48] sm:$0xff] %v236_v14  ;;  %v351_v20 = vadd.f32 %v350_v19, %v735_v52 }
 0x13f   :  { %388 = vst [vmem:[#allocation8 + $0x58] sm:$0xff] %v349_v17  ;;  %387 = vst [vmem:[#allocation8 + $0x50] sm:$0xff] %v238_v18  ;;  %v241_v21 = vpop.f32.mrb[8].mxu0 }
 0x140   :  { %404 = vst [vmem:[#allocation9 + $0x18] sm:$0xff] %v351_v20  ;;  %v242_v22 = vadd.f32 %v241_v21, %v729_v49  ;;  %v354_v23 = vpop.f32.mrb[8].mxu1  ;;  %v243_v24 = vpop.f32.mrb[9].mxu0 }
 0x141   :  { %v355_v25 = vadd.f32 %v354_v23, %v731_v50  ;;  %v244_v26 = vadd.f32 %v243_v24, %v733_v51  ;;  %v356_v27 = vpop.f32.mrb[9].mxu1 }
 0x142   :  { %389 = vst [vmem:[#allocation8 + $0x60] sm:$0xff] %v242_v22  ;;  %v357_v28 = vadd.f32 %v356_v27, %v735_v52 }
 0x143   :  { %391 = vst [vmem:[#allocation8 + $0x70] sm:$0xff] %v355_v25  ;;  %390 = vst [vmem:[#allocation8 + $0x68] sm:$0xff] %v244_v26  ;;  %v247_v29 = vpop.f32.mrb[10].mxu0 }
 0x144   :  { %405 = vst [vmem:[#allocation9 + $0x20] sm:$0xff] %v357_v28  ;;  %v248_v30 = vadd.f32 %v247_v29, %v729_v49  ;;  %v360_v31 = vpop.f32.mrb[10].mxu1  ;;  %v249_v32 = vpop.f32.mrb[11].mxu0 }
 0x145   :  { %v361_v33 = vadd.f32 %v360_v31, %v731_v50  ;;  %v250_v34 = vadd.f32 %v249_v32, %v733_v51  ;;  %v362_v35 = vpop.f32.mrb[11].mxu1 }
 0x146   :  { %392 = vst [vmem:[#allocation8 + $0x78] sm:$0xff] %v248_v30  ;;  %v363_v36 = vadd.f32 %v362_v35, %v735_v52 }
 0x147   :  { %394 = vst [vmem:[#allocation8 + $0x88] sm:$0xff] %v361_v33  ;;  %393 = vst [vmem:[#allocation8 + $0x80] sm:$0xff] %v250_v34  ;;  %v253_v37 = vpop.f32.mrb[12].mxu0 }
 0x148   :  { %406 = vst [vmem:[#allocation9 + $0x28] sm:$0xff] %v363_v36  ;;  %v254_v38 = vadd.f32 %v253_v37, %v729_v49  ;;  %v366_v39 = vpop.f32.mrb[12].mxu1  ;;  %v255_v40 = vpop.f32.mrb[13].mxu0 }
 0x149   :  { %v367_v41 = vadd.f32 %v366_v39, %v731_v50  ;;  %v256_v42 = vadd.f32 %v255_v40, %v733_v51  ;;  %v368_v43 = vpop.f32.mrb[13].mxu1 }
 0x14a   :  { %395 = vst [vmem:[#allocation8 + $0x90] sm:$0xff] %v254_v38  ;;  %v369_v44 = vadd.f32 %v368_v43, %v735_v52 }
 0x14b   :  { %397 = vst [vmem:[#allocation8 + $0xa0] sm:$0xff] %v367_v41  ;;  %396 = vst [vmem:[#allocation8 + $0x98] sm:$0xff] %v256_v42  ;;  %v259_v45 = vpop.f32.mrb[14].mxu0 }
 0x14c   :  { %407 = vst [vmem:[#allocation9 + $0x30] sm:$0xff] %v369_v44  ;;  %v260_v46 = vadd.f32 %v259_v45, %v729_v49  ;;  %v372_v47 = vpop.f32.mrb[14].mxu1  ;;  %v261_v48 = vpop.f32.mrb[15].mxu0 }
 0x14d   :  { %v373_v53 = vadd.f32 %v372_v47, %v731_v50  ;;  %v262_v0 = vadd.f32 %v261_v48, %v733_v51  ;;  %v374_v54 = vpop.f32.mrb[15].mxu1 }
 0x14e   :  { %398 = vst [vmem:[#allocation8 + $0xa8] sm:$0xff] %v260_v46  ;;  %v375_v55 = vadd.f32 %v374_v54, %v735_v52 }
 0x14f   :  { %400 = vst [vmem:[#allocation8 + $0xb8] sm:$0xff] %v373_v53  ;;  %399 = vst [vmem:[#allocation8 + $0xb0] sm:$0xff] %v262_v0 }
 0x150   :  { %408 = vst [vmem:[#allocation9 + $0x38] sm:$0xff] %v375_v55 }
 0x151   :  { %596 = shalt.err (!%p593_p0)
}
 0x152   :  { %s597_s7 = scalar_lea.hbm %s806_s3, 3072 }
 0x153   :  { %p598_p1 = scmp.ne.s32.totalorder %s806_s3, %s597_s7  ;;  %p601_p2 = scmp.lt.u32.totalorder %s597_s7, %s806_s3 }
 0x155   :  { %p603_p3 = pnand %p601_p2, %p598_p1 }
 0x157   :  { %606 = shalt.err (!%p603_p3)
}
 0x158   :  { %s647_s12 = smov 384   ;;  %s648_s14 = smov 24  }
 0x159   :  { %420 = dma.vmem_to_hbm [thread:$0]  %s415_s27, 3072, %s806_s3, [#allocation4], %s647_s12, %s647_s12, %s648_s14  }
 0x15a   :  { %s607_s17 = scalar_lea.vmem %s769_s29, 1024  ;;  %p612_p5 = scmp.lt.s32.totalorder %s769_s29, %s769_s29 }
 0x15b   :  { %p608_p4 = scmp.ne.s32.totalorder %s769_s29, %s607_s17  ;;  %p613_p6 = scmp.lt.s32.totalorder %s607_s17, %s607_s17 }
 0x15d   :  { %p614_p7 = por %p613_p6, %p612_p5 }
 0x15f   :  { %p615_p8 = pnand %p614_p7, %p608_p4 }
 0x161   :  { %618 = shalt.err (!%p615_p8)
}
 0x162   :  { %s619_s20 = scalar_lea.hbm %s807_s4, 1024 }
 0x163   :  { %p620_p9 = scmp.ne.s32.totalorder %s807_s4, %s619_s20  ;;  %p623_p10 = scmp.lt.u32.totalorder %s619_s20, %s807_s4 }
 0x165   :  { %p625_p11 = pnand %p623_p10, %p620_p9 }
 0x167   :  { %628 = shalt.err (!%p625_p11)
}
 0x168   :  { %432 = dma.vmem_to_hbm [thread:$0]  %s769_s29, 1024, %s807_s4, [#allocation10], %s641_s1, %s641_s1, %s642_s13  }
 0x169   :  { %633 = dma.done.wait [#allocation4], 3072  }
 0x16a   :  { %634 = vsyncadd [#allocation4], 4294964224 }
 0x16b   :  { %635 = dma.done.wait [#allocation10], 1024  }
 0x16c   :  { %636 = vsyncadd [#allocation10], 4294966272 }
 0x16d   :  { %439 = vsyncpa [#allocation3], 1 }
 0x16e   :  { %440 = vsyncpa [#allocation6], 1 }
 0x16f   :  { %441 = vsyncpa [#allocation4], 1 }
 0x170   :  { %442 = vsyncpa [#allocation10], 1 }

// kernel: rssm_sequence.4
= control target key start
LH: loop header
LB: loop body
LE: loop exit
PB: predicated region body
PF: predicated region fallthrough
CT: control target
= control target key end

     0   :  { %9 = vsyncpa [#allocation4], 0  ;;  %s3075_s0 = inlined_call_operand.hbm [shape: f32[8,8,384], index: 0, kind: input, shape index: {}]   ;;  %s3076_s1 = inlined_call_operand.hbm [shape: f32[8,128], index: 1, kind: input, shape index: {}]   ;;  %s3077_s2 = inlined_call_operand.hbm [shape: f32[128,384], index: 2, kind: input, shape index: {}]   ;;  %s3078_s3 = inlined_call_operand.hbm [shape: f32[1,128], index: 3, kind: input, shape index: {}]   ;;  %s3079_s4 = inlined_call_operand.hbm [shape: f32[8,8,128], index: 4, kind: output, shape index: {}]  }
   0x1   :  { %10 = vsyncpa [#allocation7], 0 }
   0x2   :  { %11 = vsyncpa [#allocation10], 0 }
   0x3   :  { %12 = vsyncpa [#allocation5], 0  ;;  %s2592_s15 = smov [#allocation6]   ;;  %s2593_s17 = smov [#allocation3]  }
   0x4   :  { %s31_s16 = sshll.u32 %s2592_s15, 4  ;;  %s18_s18 = sshll.u32 %s2593_s17, 4  ;;  %s32_s16 = int_to_ptr.vmem [resolvable:$true] %s31_s16  ;;  %s2629_s18 = int_to_ptr.vmem [resolvable:$true] %s18_s18 }
   0x5   :  { %s2474_s21 = scalar_lea.hbm %s3076_s1, 128 }
   0x6   :  { %p2475_p0 = scmp.ne.s32.totalorder %s3076_s1, %s2474_s21  ;;  %p2478_p1 = scmp.lt.u32.totalorder %s2474_s21, %s3076_s1 }
   0x8   :  { %p2480_p2 = pnand %p2478_p1, %p2475_p0 }
   0xa   :  { %2483 = shalt.err (!%p2480_p2)
}
   0xb   :  { %s2484_s26 = scalar_lea.vmem %s32_s16, 128  ;;  %p2489_p4 = scmp.lt.s32.totalorder %s32_s16, %s32_s16 }
   0xc   :  { %p2485_p3 = scmp.ne.s32.totalorder %s32_s16, %s2484_s26  ;;  %p2490_p5 = scmp.lt.s32.totalorder %s2484_s26, %s2484_s26 }
   0xe   :  { %p2491_p6 = por %p2490_p5, %p2489_p4 }
  0x10   :  { %p2492_p7 = pnand %p2491_p6, %p2485_p3 }
  0x12   :  { %2495 = shalt.err (!%p2492_p7)
}
  0x13   :  { %34 = dma.hbm_to_vmem [thread:$0]  %s3076_s1, 128, %s32_s16, [#allocation7]  }
  0x14   :  { %s2496_s5 = scalar_lea.hbm %s3075_s0, 3072 }
  0x15   :  { %p2497_p8 = scmp.ne.s32.totalorder %s3075_s0, %s2496_s5  ;;  %p2500_p9 = scmp.lt.u32.totalorder %s2496_s5, %s3075_s0 }
  0x17   :  { %p2502_p10 = pnand %p2500_p9, %p2497_p8 }
  0x19   :  { %2505 = shalt.err (!%p2502_p10)
}
  0x1a   :  { %s2506_s10 = scalar_lea.vmem %s2629_s18, 3072  ;;  %p2511_p12 = scmp.lt.s32.totalorder %s2629_s18, %s2629_s18 }
  0x1b   :  { %p2507_p11 = scmp.ne.s32.totalorder %s2629_s18, %s2506_s10  ;;  %p2512_p13 = scmp.lt.s32.totalorder %s2506_s10, %s2506_s10 }
  0x1d   :  { %p2513_p0 = por %p2512_p13, %p2511_p12 }
  0x1f   :  { %p2514_p1 = pnand %p2513_p0, %p2507_p11 }
  0x21   :  { %2517 = shalt.err (!%p2514_p1)
}
  0x22   :  { %s2594_s1 = smov 384   ;;  %s2595_s11 = smov 24  }
  0x23   :  { %24 = dma.hbm_to_vmem [thread:$0]  %s3075_s0, 3072, %s2629_s18, [#allocation4], %s2594_s1, %s2594_s1, %s2595_s11  }
  0x24   :  { %s2596_s14 = smov [#allocation8]   ;;  %s2597_s16 = smov [#allocation9]  }
  0x25   :  { %s40_s15 = sshll.u32 %s2596_s14, 4  ;;  %s53_s17 = sshll.u32 %s2597_s16, 4  ;;  %s41_s15 = int_to_ptr.vmem [resolvable:$true] %s40_s15  ;;  %s54_s17 = int_to_ptr.vmem [resolvable:$true] %s53_s17 }
  0x26   :  { %s2518_s21 = scalar_lea.hbm %s3077_s2, 6144 }
  0x27   :  { %p2519_p2 = scmp.ne.s32.totalorder %s3077_s2, %s2518_s21  ;;  %p2522_p3 = scmp.lt.u32.totalorder %s2518_s21, %s3077_s2 }
  0x29   :  { %p2524_p4 = pnand %p2522_p3, %p2519_p2 }
  0x2b   :  { %2527 = shalt.err (!%p2524_p4)
}
  0x2c   :  { %s2528_s0 = scalar_lea.vmem %s41_s15, 6144  ;;  %p2533_p6 = scmp.lt.s32.totalorder %s41_s15, %s41_s15 }
  0x2d   :  { %p2529_p5 = scmp.ne.s32.totalorder %s41_s15, %s2528_s0  ;;  %p2534_p7 = scmp.lt.s32.totalorder %s2528_s0, %s2528_s0 }
  0x2f   :  { %p2535_p8 = por %p2534_p7, %p2533_p6 }
  0x31   :  { %p2536_p9 = pnand %p2535_p8, %p2529_p5 }
  0x33   :  { %2539 = shalt.err (!%p2536_p9)
}
  0x34   :  { %46 = dma.hbm_to_vmem [thread:$0]  %s3077_s2, 6144, %s41_s15, [#allocation7], %s2594_s1, %s2594_s1, %s2595_s11  }
  0x35   :  { %s2540_s29 = scalar_lea.hbm %s3078_s3, 16 }
  0x36   :  { %p2541_p10 = scmp.ne.s32.totalorder %s3078_s3, %s2540_s29  ;;  %p2544_p11 = scmp.lt.u32.totalorder %s2540_s29, %s3078_s3 }
  0x38   :  { %p2546_p12 = pnand %p2544_p11, %p2541_p10 }
  0x3a   :  { %2549 = shalt.err (!%p2546_p12)
}
  0x3b   :  { %s2550_s8 = scalar_lea.vmem %s54_s17, 16  ;;  %s2554_s9 = scalar_lea.vmem %s54_s17, 32 }
  0x3c   :  { %p2551_p13 = scmp.ne.s32.totalorder %s54_s17, %s2550_s8  ;;  %p2555_p0 = scmp.lt.s32.totalorder %s54_s17, %s54_s17 }
  0x3d   :  { %p2556_p1 = scmp.lt.s32.totalorder %s2554_s9, %s2550_s8 }
  0x3f   :  { %p2557_p2 = por %p2556_p1, %p2555_p0 }
  0x41   :  { %p2558_p3 = pnand %p2557_p2, %p2551_p13 }
  0x43   :  { %2561 = shalt.err (!%p2558_p3)
}
  0x44   :  { %56 = dma.hbm_to_vmem [thread:$0]  %s3078_s3, 16, %s54_s17, [#allocation10]  }
  0x45   :  { %2584 = dma.done.wait [#allocation4], 3072  }
  0x46   :  { %2585 = vsyncadd [#allocation4], 4294964224 }
  0x47   :  { %2586 = dma.done.wait [#allocation7], 6272  }
  0x48   :  { %2587 = vsyncadd [#allocation7], 4294961024 }
  0x49   :  { %2588 = dma.done.wait [#allocation10], 16  }
  0x4a   :  { %2589 = vsyncadd [#allocation10], 4294967280  ;;  %v2598_v0 = vmov 0.0|0.0   ;;  %v2599_v1 = vmov 0.0   ;;  %vm2600_vm0 = vmmov 0   ;;  %v76_v2 = vld [vmem:[#allocation8 + $0x8] sm:$0xff] }
  0x4b   :  { %1966 = vmatprep.subr.bf16.mxu1 %v2598_v0  ;;  %198 = vmatprep.mubr.f32.mxu0 %v2599_v1  ;;  %v79_v3 = vld [vmem:[#allocation8 + $0x20] sm:$0xff]  ;;  %v78_v6 = vld [vmem:[#allocation8 + $0x18] sm:$0xff]  ;;  %v85_v8 = vld [vmem:[#allocation8 + $0x50] sm:$0xff]  ;;  %s2601_s3 = smov [#allocation11]  }
  0x4c   :  { %1686 = vmatprep.mubr.msk.f32.mxu1 %vm2600_vm0, %v2599_v1  ;;  %v75_v4 = vld [vmem:[#allocation8] sm:$0xff]  ;;  %v2688_v5 = vpack.c.bf16 %v79_v3, %v76_v2  ;;  %v82_v7 = vld [vmem:[#allocation8 + $0x38] sm:$0xff]  ;;  %v81_v11 = vld [vmem:[#allocation8 + $0x30] sm:$0xff]  ;;  %s1487_s1 = sshll.u32 %s2601_s3, 4  ;;  %s1488_s1 = int_to_ptr.vmem [resolvable:$true] %s1487_s1 }
  0x4d   :  { %v2690_v9 = vpack.c.bf16 %v78_v6, %v75_v4  ;;  %v2692_v10 = vpack.c.bf16 %v85_v8, %v82_v7  ;;  %v84_v12 = vld [vmem:[#allocation8 + $0x48] sm:$0xff]  ;;  %v91_v14 = vld [vmem:[#allocation8 + $0x80] sm:$0xff]  ;;  %v90_v18 = vld [vmem:[#allocation8 + $0x78] sm:$0xff]  ;;  %s2562_s11 = scalar_lea.vmem %s1488_s1, 1024  ;;  %p2567_p5 = scmp.lt.s32.totalorder %s1488_s1, %s1488_s1 }
  0x4e   :  { %v88_v13 = vld [vmem:[#allocation8 + $0x68] sm:$0xff]  ;;  %1935 = vmatprep.subr.bf16.mxu0 %v2688_v5  ;;  %v2696_v15 = vpack.c.bf16 %v84_v12, %v81_v11  ;;  %v87_v17 = vld [vmem:[#allocation8 + $0x60] sm:$0xff]  ;;  %v94_v19 = vld [vmem:[#allocation8 + $0x98] sm:$0xff]  ;;  %p2563_p4 = scmp.ne.s32.totalorder %s1488_s1, %s2562_s11  ;;  %p2568_p6 = scmp.lt.s32.totalorder %s2562_s11, %s2562_s11 }
  0x4f   :  { %1937 = vmatpush1.bf16.msra.mxu0 %v2690_v9  ;;  %v2699_v16 = vpack.c.bf16 %v91_v14, %v88_v13  ;;  %v97_v20 = vld [vmem:[#allocation8 + $0xb0] sm:$0xff]  ;;  %v2702_v21 = vpack.c.bf16 %v90_v18, %v87_v17  ;;  %v96_v24 = vld [vmem:[#allocation8 + $0xa8] sm:$0xff]  ;;  %v103_v28 = vld [vmem:[#allocation8 + $0xe0] sm:$0xff] }
  0x50   :  { %1939 = vmatprep.subr.bf16.mxu0 %v2692_v10  ;;  %v93_v22 = vld [vmem:[#allocation8 + $0x90] sm:$0xff]  ;;  %v2705_v23 = vpack.c.bf16 %v97_v20, %v94_v19  ;;  %v80_v26 = vld [vmem:[#allocation8 + $0x28] sm:$0xff]  ;;  %v83_v30 = vld [vmem:[#allocation8 + $0x40] sm:$0xff]  ;;  %p2569_p7 = por %p2568_p6, %p2567_p5 }
  0x51   :  { %v77_v25 = vld [vmem:[#allocation8 + $0x10] sm:$0xff]  ;;  %v100_v27 = vld [vmem:[#allocation8 + $0xc8] sm:$0xff]  ;;  %v86_v31 = vld [vmem:[#allocation8 + $0x58] sm:$0xff]  ;;  %v2710_v32 = vpack.c.bf16 %v96_v24, %v93_v22 }
  0x52   :  { %v2707_v29 = vpack.c.bf16 %v80_v26, %v77_v25  ;;  %v99_v33 = vld [vmem:[#allocation8 + $0xc0] sm:$0xff]  ;;  %v2713_v34 = vpack.c.bf16 %v86_v31, %v83_v30  ;;  %v2716_v35 = vpack.c.bf16 %v103_v28, %v100_v27  ;;  %v102_v36 = vld [vmem:[#allocation8 + $0xd8] sm:$0xff]  ;;  %v89_v37 = vld [vmem:[#allocation8 + $0x70] sm:$0xff]  ;;  %p2570_p8 = pnand %p2569_p7, %p2563_p4 }
  0x53   :  { %1941 = vmatpush1.bf16.msra.mxu0 %v2696_v15  ;;  %v92_v38 = vld [vmem:[#allocation8 + $0x88] sm:$0xff]  ;;  %v106_v39 = vld [vmem:[#allocation8 + $0xf8] sm:$0xff]  ;;  %v109_v40 = vld [vmem:[#allocation8 + $0x110] sm:$0xff]  ;;  %v2720_v41 = vpack.c.bf16 %v102_v36, %v99_v33 }
  0x54   :  { %1943 = vmatprep.subr.bf16.mxu0 %v2699_v16  ;;  %1968 = vmatpush3.bf16.msra.mxu1 %v2707_v29  ;;  %v105_v42 = vld [vmem:[#allocation8 + $0xf0] sm:$0xff]  ;;  %v2723_v43 = vpack.c.bf16 %v92_v38, %v89_v37  ;;  %v2726_v44 = vpack.c.bf16 %v109_v40, %v106_v39  ;;  %v108_v45 = vld [vmem:[#allocation8 + $0x108] sm:$0xff]  ;;  %v95_v46 = vld [vmem:[#allocation8 + $0xa0] sm:$0xff] }
  0x55   :  { %1969 = vmatprep.subr.bf16.mxu1 %v2598_v0  ;;  %v98_v47 = vld [vmem:[#allocation8 + $0xb8] sm:$0xff]  ;;  %v112_v48 = vld [vmem:[#allocation8 + $0x128] sm:$0xff]  ;;  %v115_v49 = vld [vmem:[#allocation8 + $0x140] sm:$0xff]  ;;  %v2730_v50 = vpack.c.bf16 %v108_v45, %v105_v42 }
  0x56   :  { %v111_v51 = vld [vmem:[#allocation8 + $0x120] sm:$0xff]  ;;  %v2733_v52 = vpack.c.bf16 %v98_v47, %v95_v46  ;;  %v2736_v53 = vpack.c.bf16 %v115_v49, %v112_v48  ;;  %v114_v54 = vld [vmem:[#allocation8 + $0x138] sm:$0xff]  ;;  %v101_v55 = vld [vmem:[#allocation8 + $0xd0] sm:$0xff] }
  0x57   :  { %1945 = vmatpush1.bf16.msra.mxu0 %v2702_v21  ;;  %v104_v56 = vld [vmem:[#allocation8 + $0xe8] sm:$0xff]  ;;  %v118_v57 = vld [vmem:[#allocation8 + $0x158] sm:$0xff]  ;;  %v121_v58 = vld [vmem:[#allocation8 + $0x170] sm:$0xff]  ;;  %v2740_v59 = vpack.c.bf16 %v114_v54, %v111_v51 }
  0x58   :  { %1947 = vmatprep.subr.bf16.mxu0 %v2705_v23  ;;  %1971 = vmatpush3.bf16.msra.mxu1 %v2713_v34  ;;  %v117_v60 = vld [vmem:[#allocation8 + $0x150] sm:$0xff]  ;;  %v2743_v61 = vpack.c.bf16 %v104_v56, %v101_v55  ;;  %v2746_v62 = vpack.c.bf16 %v121_v58, %v118_v57  ;;  %v120_v63 = vld [vmem:[#allocation8 + $0x168] sm:$0xff]  ;;  %v107_v2 = vld [vmem:[#allocation8 + $0x100] sm:$0xff] }
  0x59   :  { %1972 = vmatprep.subr.bf16.mxu1 %v2598_v0  ;;  %v110_v3 = vld [vmem:[#allocation8 + $0x118] sm:$0xff]  ;;  %v2750_v4 = vpack.c.bf16 %v120_v63, %v117_v60  ;;  %v113_v7 = vld [vmem:[#allocation8 + $0x130] sm:$0xff]  ;;  %v116_v8 = vld [vmem:[#allocation8 + $0x148] sm:$0xff] }
  0x5a   :  { %v2753_v6 = vpack.c.bf16 %v110_v3, %v107_v2  ;;  %v2758_v11 = vld [vmem:[#allocation6] sm:$0xff]  ;;  %v2761_v12 = vpack.c.bf16 %v116_v8, %v113_v7  ;;  %v119_v13 = vld [vmem:[#allocation8 + $0x160] sm:$0xff]  ;;  %v133_v42 = vld [vmem:[#allocation3 + $0x10] sm:$0xff] }
  0x5b   :  { %1949 = vmatpush1.bf16.msra.mxu0 %v2710_v32  ;;  %v122_v14 = vld [vmem:[#allocation8 + $0x178] sm:$0xff]  ;;  %v132_v22 = vld [vmem:[#allocation3 + $0x8] sm:$0xff]  ;;  %v299_v56 = vld [vmem:[#allocation3 + $0x18] sm:$0xff] }
  0x5c   :  { %1951 = vmatprep.subr.bf16.mxu0 %v2716_v35  ;;  %1974 = vmatpush3.bf16.msra.mxu1 %v2723_v43  ;;  %v2767_v17 = vpack.c.bf16 %v122_v14, %v119_v13  ;;  %v131_v18 = vld [vmem:[#allocation3] sm:$0xff]  ;;  %v2808_v37 = vld [vmem:[#allocation9] ss:$0 sm:$0xff] }
  0x5d   :  { %1975 = vmatprep.subr.bf16.mxu1 %v2598_v0  ;;  %v300_v63 = vld [vmem:[#allocation3 + $0x20] sm:$0xff] }
  0x5f   :  { %1953 = vmatpush1.bf16.msra.mxu0 %v2720_v41 }
  0x60   :  { %1955 = vmatprep.subr.bf16.mxu0 %v2726_v44  ;;  %1977 = vmatpush3.bf16.msra.mxu1 %v2733_v52 }
  0x61   :  { %1978 = vmatprep.subr.bf16.mxu1 %v2598_v0 }
  0x63   :  { %1957 = vmatpush1.bf16.msra.mxu0 %v2730_v50 }
  0x64   :  { %1959 = vmatprep.subr.bf16.mxu0 %v2736_v53  ;;  %1980 = vmatpush3.bf16.msra.mxu1 %v2743_v61 }
  0x65   :  { %1981 = vmatprep.subr.bf16.mxu1 %v2598_v0 }
  0x67   :  { %1961 = vmatpush1.bf16.msra.mxu0 %v2740_v59 }
  0x68   :  { %1963 = vmatprep.subr.bf16.mxu0 %v2746_v62  ;;  %1983 = vmatpush3.bf16.msra.mxu1 %v2753_v6 }
  0x69   :  { %1984 = vmatprep.subr.bf16.mxu1 %v2598_v0 }
  0x6b   :  { %1965 = vmatpush1.bf16.msra.mxu0 %v2750_v4 }
  0x6c   :  { %1991 = vmatprep.subr.bf16.mxu0 %v2688_v5  ;;  %1986 = vmatpush3.bf16.msra.mxu1 %v2761_v12 }
  0x6d   :  { %1987 = vmatprep.subr.bf16.mxu1 %v2598_v0 }
  0x6e   :  { %199 = vmatmul.mubr.f32.vlgmr.msra.gmra.mrb[0].mxu0 %v2758_v11 }
  0x6f   :  { %1993 = vmatpush1.bf16.msra.mxu0 %v2690_v9  ;;  %366 = vmatprep.mubr.f32.mxu0 %v2599_v1 }
  0x70   :  { %1995 = vmatprep.subr.bf16.mxu0 %v2692_v10  ;;  %1989 = vmatpush3.bf16.msra.mxu1 %v2767_v17 }
  0x71   :  { %2022 = vmatprep.subr.bf16.mxu1 %v2598_v0 }
  0x73   :  { %1997 = vmatpush1.bf16.msra.mxu0 %v2696_v15  ;;  %1687 = vmatmul.mubr.f32.vlgmr.msra.gmra.mrb[0].mxu1 %v2758_v11 }
  0x74   :  { %1999 = vmatprep.subr.bf16.mxu0 %v2699_v16  ;;  %2024 = vmatpush3.bf16.msra.mxu1 %v2707_v29 }
  0x75   :  { %2025 = vmatprep.subr.bf16.mxu1 %v2598_v0  ;;  %1721 = vmatprep.mubr.msk.f32.mxu1 %vm2600_vm0, %v2599_v1 }
  0x77   :  { %2001 = vmatpush1.bf16.msra.mxu0 %v2702_v21 }
  0x78   :  { %2003 = vmatprep.subr.bf16.mxu0 %v2705_v23  ;;  %2027 = vmatpush3.bf16.msra.mxu1 %v2713_v34 }
  0x79   :  { %2028 = vmatprep.subr.bf16.mxu1 %v2598_v0 }
  0x7b   :  { %2005 = vmatpush1.bf16.msra.mxu0 %v2710_v32 }
  0x7c   :  { %2007 = vmatprep.subr.bf16.mxu0 %v2716_v35  ;;  %2030 = vmatpush3.bf16.msra.mxu1 %v2723_v43 }
  0x7d   :  { %2031 = vmatprep.subr.bf16.mxu1 %v2598_v0 }
  0x7f   :  { %2009 = vmatpush1.bf16.msra.mxu0 %v2720_v41 }
  0x80   :  { %2011 = vmatprep.subr.bf16.mxu0 %v2726_v44  ;;  %2033 = vmatpush3.bf16.msra.mxu1 %v2733_v52 }
  0x81   :  { %2034 = vmatprep.subr.bf16.mxu1 %v2598_v0 }
  0x83   :  { %2013 = vmatpush1.bf16.msra.mxu0 %v2730_v50 }
  0x84   :  { %2015 = vmatprep.subr.bf16.mxu0 %v2736_v53  ;;  %2036 = vmatpush3.bf16.msra.mxu1 %v2743_v61 }
  0x85   :  { %2037 = vmatprep.subr.bf16.mxu1 %v2598_v0 }
  0x87   :  { %2017 = vmatpush1.bf16.msra.mxu0 %v2740_v59 }
  0x88   :  { %2019 = vmatprep.subr.bf16.mxu0 %v2746_v62  ;;  %2039 = vmatpush3.bf16.msra.mxu1 %v2753_v6 }
  0x89   :  { %2040 = vmatprep.subr.bf16.mxu1 %v2598_v0 }
  0x8b   :  { %2021 = vmatpush1.bf16.msra.mxu0 %v2750_v4 }
  0x8c   :  { %2047 = vmatprep.subr.bf16.mxu0 %v2688_v5  ;;  %2042 = vmatpush3.bf16.msra.mxu1 %v2761_v12 }
  0x8d   :  { %2043 = vmatprep.subr.bf16.mxu1 %v2598_v0 }
  0x90   :  { %2045 = vmatpush3.bf16.msra.mxu1 %v2767_v17 }
  0x91   :  { %2078 = vmatprep.subr.bf16.mxu1 %v2598_v0 }
 0x141   :  { %v200_v19 = vpop.f32.mrb[0].mxu0 }
 0x142   :  { %v275_v20 = vadd.f32 %v200_v19, %v131_v18  ;;  %v202_v24 = vpop.f32.mrb[1].mxu0 }
 0x143   :  { %v282_v26 = vadd.f32 %v202_v24, %v132_v22  ;;  %v301_v24 = vld [vmem:[#allocation3 + $0x28] sm:$0xff] }
 0x144   :  { %v1502_v25 = vmul.f32 -1.442695, %v275_v20 }
 0x145   :  { %v1503_v27 = vmul.f32 -1.442695, %v282_v26 }
 0x146   :  { %2394 = vpow2.f32 %v1502_v25  ;;  %v271_v28 = vpop.f32.mrb[0].mxu1 }
 0x147   :  { %v1688_v30 = vpop.f32.mrb[1].mxu1  ;;  %2396 = vpow2.f32 %v1503_v27  ;;  %v289_v39 = vadd.f32 %v2808_v37, %v271_v28 }
 0x150   :  { %v2395_v31 = vpop.eup %2394 }
 0x151   :  { %v279_v33 = vadd.f32 1.0, %v2395_v31  ;;  %v2397_v36 = vpop.eup %2396 }
 0x152   :  { %v286_v38 = vadd.f32 1.0, %v2397_v36 }
 0x153   :  { %2398 = vrcp.f32 %v279_v33 }
 0x154   :  { %2400 = vrcp.f32 %v286_v38  ;;  %v468_v38 = vld [vmem:[#allocation3 + $0x30] sm:$0xff] }
 0x15d   :  { %v2399_v40 = vpop.eup %2398 }
 0x15e   :  { %v290_v45 = vmul.f32 %v2399_v40, %v289_v39  ;;  %v2401_v47 = vpop.eup %2400 }
 0x15f   :  { %v293_v48 = vsub.f32 1.0, %v2401_v47  ;;  %v295_v54 = vmul.f32 %v2401_v47, %v2758_v11 }
 0x160   :  { %v291_v46 = vadd.f32 %v290_v45, %v133_v42  ;;  %v469_v45 = vld [vmem:[#allocation3 + $0x38] sm:$0xff] }
 0x162   :  { %2402 = vtanh.f32 %v291_v46 }
 0x16c   :  { %v2403_v49 = vpop.eup %2402 }
 0x16d   :  { %v294_v51 = vmul.f32 %v2403_v49, %v293_v48 }
 0x16f   :  { %v2812_v55 = vadd.f32 %v295_v54, %v294_v51 }
 0x171   :  { %297 = vst [vmem:[#allocation11] sm:$0xff] %v2812_v55  ;;  %367 = vmatmul.mubr.f32.vlgmr.msra.gmra.mrb[2].mxu0 %v2812_v55  ;;  %1722 = vmatmul.mubr.f32.vlgmr.msra.gmra.mrb[2].mxu1 %v2812_v55 }
 0x172   :  { %2049 = vmatpush1.bf16.msra.mxu0 %v2690_v9  ;;  %2080 = vmatpush3.bf16.msra.mxu1 %v2707_v29 }
 0x173   :  { %2051 = vmatprep.subr.bf16.mxu0 %v2692_v10  ;;  %2081 = vmatprep.subr.bf16.mxu1 %v2598_v0 }
 0x174   :  { %535 = vmatprep.mubr.f32.mxu0 %v2599_v1  ;;  %1756 = vmatprep.mubr.msk.f32.mxu1 %vm2600_vm0, %v2599_v1 }
 0x176   :  { %2053 = vmatpush1.bf16.msra.mxu0 %v2696_v15  ;;  %2083 = vmatpush3.bf16.msra.mxu1 %v2713_v34 }
 0x177   :  { %2055 = vmatprep.subr.bf16.mxu0 %v2699_v16  ;;  %2084 = vmatprep.subr.bf16.mxu1 %v2598_v0 }
 0x17a   :  { %2057 = vmatpush1.bf16.msra.mxu0 %v2702_v21  ;;  %2086 = vmatpush3.bf16.msra.mxu1 %v2723_v43 }
 0x17b   :  { %2059 = vmatprep.subr.bf16.mxu0 %v2705_v23  ;;  %2087 = vmatprep.subr.bf16.mxu1 %v2598_v0 }
 0x17e   :  { %2061 = vmatpush1.bf16.msra.mxu0 %v2710_v32  ;;  %2089 = vmatpush3.bf16.msra.mxu1 %v2733_v52 }
 0x17f   :  { %2063 = vmatprep.subr.bf16.mxu0 %v2716_v35  ;;  %2090 = vmatprep.subr.bf16.mxu1 %v2598_v0 }
 0x182   :  { %2065 = vmatpush1.bf16.msra.mxu0 %v2720_v41  ;;  %2092 = vmatpush3.bf16.msra.mxu1 %v2743_v61 }
 0x183   :  { %2067 = vmatprep.subr.bf16.mxu0 %v2726_v44  ;;  %2093 = vmatprep.subr.bf16.mxu1 %v2598_v0 }
 0x186   :  { %2069 = vmatpush1.bf16.msra.mxu0 %v2730_v50  ;;  %2095 = vmatpush3.bf16.msra.mxu1 %v2753_v6 }
 0x187   :  { %2071 = vmatprep.subr.bf16.mxu0 %v2736_v53  ;;  %2096 = vmatprep.subr.bf16.mxu1 %v2598_v0 }
 0x18a   :  { %2073 = vmatpush1.bf16.msra.mxu0 %v2740_v59  ;;  %2098 = vmatpush3.bf16.msra.mxu1 %v2761_v12 }
 0x18b   :  { %2075 = vmatprep.subr.bf16.mxu0 %v2746_v62  ;;  %2099 = vmatprep.subr.bf16.mxu1 %v2598_v0 }
 0x18e   :  { %2077 = vmatpush1.bf16.msra.mxu0 %v2750_v4  ;;  %2101 = vmatpush3.bf16.msra.mxu1 %v2767_v17 }
 0x18f   :  { %2103 = vmatprep.subr.bf16.mxu0 %v2688_v5  ;;  %2134 = vmatprep.subr.bf16.mxu1 %v2598_v0 }
 0x244   :  { %v368_v57 = vpop.f32.mrb[2].mxu0  ;;  %v439_v58 = vpop.f32.mrb[2].mxu1 }
 0x245   :  { %v443_v60 = vadd.f32 %v368_v57, %v299_v56  ;;  %v370_v2 = vpop.f32.mrb[3].mxu0  ;;  %v1723_v3 = vpop.f32.mrb[3].mxu1  ;;  %v457_v20 = vadd.f32 %v2808_v37, %v439_v58 }
 0x246   :  { %v450_v8 = vadd.f32 %v370_v2, %v300_v63  ;;  %v470_v63 = vld [vmem:[#allocation3 + $0x40] sm:$0xff] }
 0x247   :  { %v1504_v7 = vmul.f32 -1.442695, %v443_v60 }
 0x248   :  { %v1505_v11 = vmul.f32 -1.442695, %v450_v8 }
 0x249   :  { %2404 = vpow2.f32 %v1504_v7 }
 0x24a   :  { %2406 = vpow2.f32 %v1505_v11 }
 0x253   :  { %v2405_v13 = vpop.eup %2404 }
 0x254   :  { %v447_v14 = vadd.f32 1.0, %v2405_v13  ;;  %v2407_v18 = vpop.eup %2406 }
 0x255   :  { %v454_v19 = vadd.f32 1.0, %v2407_v18 }
 0x256   :  { %2408 = vrcp.f32 %v447_v14 }
 0x257   :  { %2410 = vrcp.f32 %v454_v19  ;;  %v637_v19 = vld [vmem:[#allocation3 + $0x48] sm:$0xff] }
 0x260   :  { %v2409_v22 = vpop.eup %2408 }
 0x261   :  { %v458_v25 = vmul.f32 %v2409_v22, %v457_v20  ;;  %v2411_v27 = vpop.eup %2410 }
 0x262   :  { %v461_v28 = vsub.f32 1.0, %v2411_v27  ;;  %v463_v33 = vmul.f32 %v2411_v27, %v2812_v55 }
 0x263   :  { %v459_v26 = vadd.f32 %v458_v25, %v301_v24  ;;  %v638_v25 = vld [vmem:[#allocation3 + $0x50] sm:$0xff] }
 0x265   :  { %2412 = vtanh.f32 %v459_v26 }
 0x26f   :  { %v2413_v30 = vpop.eup %2412 }
 0x270   :  { %v462_v31 = vmul.f32 %v2413_v30, %v461_v28 }
 0x272   :  { %v2854_v36 = vadd.f32 %v463_v33, %v462_v31 }
 0x274   :  { %466 = vst [vmem:[#allocation11 + $0x8] sm:$0xff] %v2854_v36  ;;  %536 = vmatmul.mubr.f32.vlgmr.msra.gmra.mrb[4].mxu0 %v2854_v36  ;;  %1757 = vmatmul.mubr.f32.vlgmr.msra.gmra.mrb[4].mxu1 %v2854_v36 }
 0x275   :  { %2105 = vmatpush1.bf16.msra.mxu0 %v2690_v9  ;;  %2136 = vmatpush3.bf16.msra.mxu1 %v2707_v29 }
 0x276   :  { %2107 = vmatprep.subr.bf16.mxu0 %v2692_v10  ;;  %2137 = vmatprep.subr.bf16.mxu1 %v2598_v0 }
 0x277   :  { %704 = vmatprep.mubr.f32.mxu0 %v2599_v1  ;;  %1791 = vmatprep.mubr.msk.f32.mxu1 %vm2600_vm0, %v2599_v1 }
 0x279   :  { %2109 = vmatpush1.bf16.msra.mxu0 %v2696_v15  ;;  %2139 = vmatpush3.bf16.msra.mxu1 %v2713_v34 }
 0x27a   :  { %2111 = vmatprep.subr.bf16.mxu0 %v2699_v16  ;;  %2140 = vmatprep.subr.bf16.mxu1 %v2598_v0 }
 0x27d   :  { %2113 = vmatpush1.bf16.msra.mxu0 %v2702_v21  ;;  %2142 = vmatpush3.bf16.msra.mxu1 %v2723_v43 }
 0x27e   :  { %2115 = vmatprep.subr.bf16.mxu0 %v2705_v23  ;;  %2143 = vmatprep.subr.bf16.mxu1 %v2598_v0 }
 0x281   :  { %2117 = vmatpush1.bf16.msra.mxu0 %v2710_v32  ;;  %2145 = vmatpush3.bf16.msra.mxu1 %v2733_v52 }
 0x282   :  { %2119 = vmatprep.subr.bf16.mxu0 %v2716_v35  ;;  %2146 = vmatprep.subr.bf16.mxu1 %v2598_v0 }
 0x285   :  { %2121 = vmatpush1.bf16.msra.mxu0 %v2720_v41  ;;  %2148 = vmatpush3.bf16.msra.mxu1 %v2743_v61 }
 0x286   :  { %2123 = vmatprep.subr.bf16.mxu0 %v2726_v44  ;;  %2149 = vmatprep.subr.bf16.mxu1 %v2598_v0 }
 0x289   :  { %2125 = vmatpush1.bf16.msra.mxu0 %v2730_v50  ;;  %2151 = vmatpush3.bf16.msra.mxu1 %v2753_v6 }
 0x28a   :  { %2127 = vmatprep.subr.bf16.mxu0 %v2736_v53  ;;  %2152 = vmatprep.subr.bf16.mxu1 %v2598_v0 }
 0x28d   :  { %2129 = vmatpush1.bf16.msra.mxu0 %v2740_v59  ;;  %2154 = vmatpush3.bf16.msra.mxu1 %v2761_v12 }
 0x28e   :  { %2131 = vmatprep.subr.bf16.mxu0 %v2746_v62  ;;  %2155 = vmatprep.subr.bf16.mxu1 %v2598_v0 }
 0x291   :  { %2133 = vmatpush1.bf16.msra.mxu0 %v2750_v4  ;;  %2157 = vmatpush3.bf16.msra.mxu1 %v2767_v17 }
 0x292   :  { %2159 = vmatprep.subr.bf16.mxu0 %v2688_v5  ;;  %2190 = vmatprep.subr.bf16.mxu1 %v2598_v0 }
 0x347   :  { %v537_v39 = vpop.f32.mrb[4].mxu0  ;;  %v608_v40 = vpop.f32.mrb[4].mxu1 }
 0x348   :  { %v612_v42 = vadd.f32 %v537_v39, %v468_v38  ;;  %v539_v46 = vpop.f32.mrb[5].mxu0  ;;  %v1758_v47 = vpop.f32.mrb[5].mxu1  ;;  %v626_v58 = vadd.f32 %v2808_v37, %v608_v40 }
 0x349   :  { %v619_v49 = vadd.f32 %v539_v46, %v469_v45  ;;  %v639_v45 = vld [vmem:[#allocation3 + $0x58] sm:$0xff] }
 0x34a   :  { %v1506_v48 = vmul.f32 -1.442695, %v612_v42 }
 0x34b   :  { %v1507_v51 = vmul.f32 -1.442695, %v619_v49 }
 0x34c   :  { %2414 = vpow2.f32 %v1506_v48 }
 0x34d   :  { %2416 = vpow2.f32 %v1507_v51 }
 0x356   :  { %v2415_v54 = vpop.eup %2414 }
 0x357   :  { %v616_v55 = vadd.f32 1.0, %v2415_v54  ;;  %v2417_v56 = vpop.eup %2416 }
 0x358   :  { %v623_v57 = vadd.f32 1.0, %v2417_v56 }
 0x359   :  { %2418 = vrcp.f32 %v616_v55 }
 0x35a   :  { %2420 = vrcp.f32 %v623_v57  ;;  %v806_v57 = vld [vmem:[#allocation3 + $0x60] sm:$0xff] }
 0x363   :  { %v2419_v60 = vpop.eup %2418 }
 0x364   :  { %v627_v2 = vmul.f32 %v2419_v60, %v626_v58  ;;  %v2421_v7 = vpop.eup %2420 }
 0x365   :  { %v630_v8 = vsub.f32 1.0, %v2421_v7  ;;  %v632_v14 = vmul.f32 %v2421_v7, %v2854_v36 }
 0x366   :  { %v628_v3 = vadd.f32 %v627_v2, %v470_v63  ;;  %v807_v2 = vld [vmem:[#allocation3 + $0x68] sm:$0xff] }
 0x368   :  { %2422 = vtanh.f32 %v628_v3 }
 0x372   :  { %v2423_v11 = vpop.eup %2422 }
 0x373   :  { %v631_v13 = vmul.f32 %v2423_v11, %v630_v8 }
 0x375   :  { %v2896_v18 = vadd.f32 %v632_v14, %v631_v13 }
 0x377   :  { %635 = vst [vmem:[#allocation11 + $0x10] sm:$0xff] %v2896_v18  ;;  %705 = vmatmul.mubr.f32.vlgmr.msra.gmra.mrb[6].mxu0 %v2896_v18  ;;  %1792 = vmatmul.mubr.f32.vlgmr.msra.gmra.mrb[6].mxu1 %v2896_v18 }
 0x378   :  { %2161 = vmatpush1.bf16.msra.mxu0 %v2690_v9  ;;  %2192 = vmatpush3.bf16.msra.mxu1 %v2707_v29 }
 0x379   :  { %2163 = vmatprep.subr.bf16.mxu0 %v2692_v10  ;;  %2193 = vmatprep.subr.bf16.mxu1 %v2598_v0 }
 0x37a   :  { %873 = vmatprep.mubr.f32.mxu0 %v2599_v1  ;;  %1826 = vmatprep.mubr.msk.f32.mxu1 %vm2600_vm0, %v2599_v1 }
 0x37c   :  { %2165 = vmatpush1.bf16.msra.mxu0 %v2696_v15  ;;  %2195 = vmatpush3.bf16.msra.mxu1 %v2713_v34 }
 0x37d   :  { %2167 = vmatprep.subr.bf16.mxu0 %v2699_v16  ;;  %2196 = vmatprep.subr.bf16.mxu1 %v2598_v0 }
 0x380   :  { %2169 = vmatpush1.bf16.msra.mxu0 %v2702_v21  ;;  %2198 = vmatpush3.bf16.msra.mxu1 %v2723_v43 }
 0x381   :  { %2171 = vmatprep.subr.bf16.mxu0 %v2705_v23  ;;  %2199 = vmatprep.subr.bf16.mxu1 %v2598_v0 }
 0x384   :  { %2173 = vmatpush1.bf16.msra.mxu0 %v2710_v32  ;;  %2201 = vmatpush3.bf16.msra.mxu1 %v2733_v52 }
 0x385   :  { %2175 = vmatprep.subr.bf16.mxu0 %v2716_v35  ;;  %2202 = vmatprep.subr.bf16.mxu1 %v2598_v0 }
 0x388   :  { %2177 = vmatpush1.bf16.msra.mxu0 %v2720_v41  ;;  %2204 = vmatpush3.bf16.msra.mxu1 %v2743_v61 }
 0x389   :  { %2179 = vmatprep.subr.bf16.mxu0 %v2726_v44  ;;  %2205 = vmatprep.subr.bf16.mxu1 %v2598_v0 }
 0x38c   :  { %2181 = vmatpush1.bf16.msra.mxu0 %v2730_v50  ;;  %2207 = vmatpush3.bf16.msra.mxu1 %v2753_v6 }
 0x38d   :  { %2183 = vmatprep.subr.bf16.mxu0 %v2736_v53  ;;  %2208 = vmatprep.subr.bf16.mxu1 %v2598_v0 }
 0x390   :  { %2185 = vmatpush1.bf16.msra.mxu0 %v2740_v59  ;;  %2210 = vmatpush3.bf16.msra.mxu1 %v2761_v12 }
 0x391   :  { %2187 = vmatprep.subr.bf16.mxu0 %v2746_v62  ;;  %2211 = vmatprep.subr.bf16.mxu1 %v2598_v0 }
 0x394   :  { %2189 = vmatpush1.bf16.msra.mxu0 %v2750_v4  ;;  %2213 = vmatpush3.bf16.msra.mxu1 %v2767_v17 }
 0x395   :  { %2215 = vmatprep.subr.bf16.mxu0 %v2688_v5  ;;  %2246 = vmatprep.subr.bf16.mxu1 %v2598_v0 }
 0x44a   :  { %v706_v20 = vpop.f32.mrb[6].mxu0  ;;  %v777_v22 = vpop.f32.mrb[6].mxu1 }
 0x44b   :  { %v781_v24 = vadd.f32 %v706_v20, %v637_v19  ;;  %v708_v26 = vpop.f32.mrb[7].mxu0  ;;  %v1793_v27 = vpop.f32.mrb[7].mxu1  ;;  %v795_v40 = vadd.f32 %v2808_v37, %v777_v22 }
 0x44c   :  { %v788_v30 = vadd.f32 %v708_v26, %v638_v25  ;;  %v808_v25 = vld [vmem:[#allocation3 + $0x70] sm:$0xff] }
 0x44d   :  { %v1508_v28 = vmul.f32 -1.442695, %v781_v24 }
 0x44e   :  { %v1509_v31 = vmul.f32 -1.442695, %v788_v30 }
 0x44f   :  { %2424 = vpow2.f32 %v1508_v28 }
 0x450   :  { %2426 = vpow2.f32 %v1509_v31 }
 0x459   :  { %v2425_v33 = vpop.eup %2424 }
 0x45a   :  { %v785_v36 = vadd.f32 1.0, %v2425_v33  ;;  %v2427_v38 = vpop.eup %2426 }
 0x45b   :  { %v792_v39 = vadd.f32 1.0, %v2427_v38 }
 0x45c   :  { %2428 = vrcp.f32 %v785_v36 }
 0x45d   :  { %2430 = vrcp.f32 %v792_v39  ;;  %v975_v39 = vld [vmem:[#allocation3 + $0x78] sm:$0xff] }
 0x466   :  { %v2429_v42 = vpop.eup %2428 }
 0x467   :  { %v796_v46 = vmul.f32 %v2429_v42, %v795_v40  ;;  %v2431_v48 = vpop.eup %2430 }
 0x468   :  { %v799_v49 = vsub.f32 1.0, %v2431_v48  ;;  %v801_v55 = vmul.f32 %v2431_v48, %v2896_v18 }
 0x469   :  { %v797_v47 = vadd.f32 %v796_v46, %v639_v45  ;;  %v976_v46 = vld [vmem:[#allocation3 + $0x80] sm:$0xff] }
 0x46b   :  { %2432 = vtanh.f32 %v797_v47 }
 0x475   :  { %v2433_v51 = vpop.eup %2432 }
 0x476   :  { %v800_v54 = vmul.f32 %v2433_v51, %v799_v49 }
 0x478   :  { %v2938_v56 = vadd.f32 %v801_v55, %v800_v54 }
 0x47a   :  { %804 = vst [vmem:[#allocation11 + $0x18] sm:$0xff] %v2938_v56  ;;  %874 = vmatmul.mubr.f32.vlgmr.msra.gmra.mrb[8].mxu0 %v2938_v56  ;;  %1827 = vmatmul.mubr.f32.vlgmr.msra.gmra.mrb[8].mxu1 %v2938_v56 }
 0x47b   :  { %2217 = vmatpush1.bf16.msra.mxu0 %v2690_v9  ;;  %2248 = vmatpush3.bf16.msra.mxu1 %v2707_v29 }
 0x47c   :  { %2219 = vmatprep.subr.bf16.mxu0 %v2692_v10  ;;  %2249 = vmatprep.subr.bf16.mxu1 %v2598_v0 }
 0x47d   :  { %1042 = vmatprep.mubr.f32.mxu0 %v2599_v1  ;;  %1861 = vmatprep.mubr.msk.f32.mxu1 %vm2600_vm0, %v2599_v1 }
 0x47f   :  { %2221 = vmatpush1.bf16.msra.mxu0 %v2696_v15  ;;  %2251 = vmatpush3.bf16.msra.mxu1 %v2713_v34 }
 0x480   :  { %2223 = vmatprep.subr.bf16.mxu0 %v2699_v16  ;;  %2252 = vmatprep.subr.bf16.mxu1 %v2598_v0 }
 0x483   :  { %2225 = vmatpush1.bf16.msra.mxu0 %v2702_v21  ;;  %2254 = vmatpush3.bf16.msra.mxu1 %v2723_v43 }
 0x484   :  { %2227 = vmatprep.subr.bf16.mxu0 %v2705_v23  ;;  %2255 = vmatprep.subr.bf16.mxu1 %v2598_v0 }
 0x487   :  { %2229 = vmatpush1.bf16.msra.mxu0 %v2710_v32  ;;  %2257 = vmatpush3.bf16.msra.mxu1 %v2733_v52 }
 0x488   :  { %2231 = vmatprep.subr.bf16.mxu0 %v2716_v35  ;;  %2258 = vmatprep.subr.bf16.mxu1 %v2598_v0 }
 0x48b   :  { %2233 = vmatpush1.bf16.msra.mxu0 %v2720_v41  ;;  %2260 = vmatpush3.bf16.msra.mxu1 %v2743_v61 }
 0x48c   :  { %2235 = vmatprep.subr.bf16.mxu0 %v2726_v44  ;;  %2261 = vmatprep.subr.bf16.mxu1 %v2598_v0 }
 0x48f   :  { %2237 = vmatpush1.bf16.msra.mxu0 %v2730_v50  ;;  %2263 = vmatpush3.bf16.msra.mxu1 %v2753_v6 }
 0x490   :  { %2239 = vmatprep.subr.bf16.mxu0 %v2736_v53  ;;  %2264 = vmatprep.subr.bf16.mxu1 %v2598_v0 }
 0x493   :  { %2241 = vmatpush1.bf16.msra.mxu0 %v2740_v59  ;;  %2266 = vmatpush3.bf16.msra.mxu1 %v2761_v12 }
 0x494   :  { %2243 = vmatprep.subr.bf16.mxu0 %v2746_v62  ;;  %2267 = vmatprep.subr.bf16.mxu1 %v2598_v0 }
 0x497   :  { %2245 = vmatpush1.bf16.msra.mxu0 %v2750_v4  ;;  %2269 = vmatpush3.bf16.msra.mxu1 %v2767_v17 }
 0x498   :  { %2271 = vmatprep.subr.bf16.mxu0 %v2688_v5  ;;  %2302 = vmatprep.subr.bf16.mxu1 %v2598_v0 }
 0x54d   :  { %v875_v58 = vpop.f32.mrb[8].mxu0  ;;  %v946_v60 = vpop.f32.mrb[8].mxu1 }
 0x54e   :  { %v950_v63 = vadd.f32 %v875_v58, %v806_v57  ;;  %v877_v3 = vpop.f32.mrb[9].mxu0  ;;  %v1828_v7 = vpop.f32.mrb[9].mxu1  ;;  %v964_v22 = vadd.f32 %v2808_v37, %v946_v60 }
 0x54f   :  { %v957_v11 = vadd.f32 %v877_v3, %v807_v2 }
 0x550   :  { %v1510_v8 = vmul.f32 -1.442695, %v950_v63  ;;  %v977_v63 = vld [vmem:[#allocation3 + $0x88] sm:$0xff] }
 0x551   :  { %v1511_v13 = vmul.f32 -1.442695, %v957_v11 }
 0x552   :  { %2434 = vpow2.f32 %v1510_v8 }
 0x553   :  { %2436 = vpow2.f32 %v1511_v13 }
 0x55c   :  { %v2435_v14 = vpop.eup %2434 }
 0x55d   :  { %v954_v18 = vadd.f32 1.0, %v2435_v14  ;;  %v2437_v19 = vpop.eup %2436 }
 0x55e   :  { %v961_v20 = vadd.f32 1.0, %v2437_v19  ;;  %v1313_v19 = vld [vmem:[#allocation3 + $0xa8] sm:$0xff] }
 0x55f   :  { %2438 = vrcp.f32 %v954_v18 }
 0x560   :  { %2440 = vrcp.f32 %v961_v20 }
 0x569   :  { %v2439_v24 = vpop.eup %2438 }
 0x56a   :  { %v965_v26 = vmul.f32 %v2439_v24, %v964_v22  ;;  %v2441_v28 = vpop.eup %2440 }
 0x56b   :  { %v968_v30 = vsub.f32 1.0, %v2441_v28  ;;  %v970_v36 = vmul.f32 %v2441_v28, %v2938_v56 }
 0x56c   :  { %v966_v27 = vadd.f32 %v965_v26, %v808_v25  ;;  %v1314_v25 = vld [vmem:[#allocation3 + $0xb0] sm:$0xff] }
 0x56e   :  { %2442 = vtanh.f32 %v966_v27 }
 0x578   :  { %v2443_v31 = vpop.eup %2442 }
 0x579   :  { %v969_v33 = vmul.f32 %v2443_v31, %v968_v30 }
 0x57b   :  { %v2980_v38 = vadd.f32 %v970_v36, %v969_v33 }
 0x57d   :  { %973 = vst [vmem:[#allocation11 + $0x20] sm:$0xff] %v2980_v38  ;;  %1043 = vmatmul.mubr.f32.vlgmr.msra.gmra.mrb[10].mxu0 %v2980_v38  ;;  %1862 = vmatmul.mubr.f32.vlgmr.msra.gmra.mrb[10].mxu1 %v2980_v38 }
 0x57e   :  { %2273 = vmatpush1.bf16.msra.mxu0 %v2690_v9  ;;  %2304 = vmatpush3.bf16.msra.mxu1 %v2707_v29 }
 0x57f   :  { %2275 = vmatprep.subr.bf16.mxu0 %v2692_v10  ;;  %2305 = vmatprep.subr.bf16.mxu1 %v2598_v0 }
 0x580   :  { %1211 = vmatprep.mubr.f32.mxu0 %v2599_v1  ;;  %1896 = vmatprep.mubr.msk.f32.mxu1 %vm2600_vm0, %v2599_v1 }
 0x582   :  { %2277 = vmatpush1.bf16.msra.mxu0 %v2696_v15  ;;  %2307 = vmatpush3.bf16.msra.mxu1 %v2713_v34 }
 0x583   :  { %2279 = vmatprep.subr.bf16.mxu0 %v2699_v16  ;;  %2308 = vmatprep.subr.bf16.mxu1 %v2598_v0 }
 0x586   :  { %2281 = vmatpush1.bf16.msra.mxu0 %v2702_v21  ;;  %2310 = vmatpush3.bf16.msra.mxu1 %v2723_v43 }
 0x587   :  { %2283 = vmatprep.subr.bf16.mxu0 %v2705_v23  ;;  %2311 = vmatprep.subr.bf16.mxu1 %v2598_v0 }
 0x58a   :  { %2285 = vmatpush1.bf16.msra.mxu0 %v2710_v32  ;;  %2313 = vmatpush3.bf16.msra.mxu1 %v2733_v52 }
 0x58b   :  { %2287 = vmatprep.subr.bf16.mxu0 %v2716_v35  ;;  %2314 = vmatprep.subr.bf16.mxu1 %v2598_v0 }
 0x58e   :  { %2289 = vmatpush1.bf16.msra.mxu0 %v2720_v41  ;;  %2316 = vmatpush3.bf16.msra.mxu1 %v2743_v61 }
 0x58f   :  { %2291 = vmatprep.subr.bf16.mxu0 %v2726_v44  ;;  %2317 = vmatprep.subr.bf16.mxu1 %v2598_v0 }
 0x592   :  { %2293 = vmatpush1.bf16.msra.mxu0 %v2730_v50  ;;  %2319 = vmatpush3.bf16.msra.mxu1 %v2753_v6 }
 0x593   :  { %2295 = vmatprep.subr.bf16.mxu0 %v2736_v53  ;;  %2320 = vmatprep.subr.bf16.mxu1 %v2598_v0 }
 0x596   :  { %2297 = vmatpush1.bf16.msra.mxu0 %v2740_v59  ;;  %2322 = vmatpush3.bf16.msra.mxu1 %v2761_v12 }
 0x597   :  { %2299 = vmatprep.subr.bf16.mxu0 %v2746_v62  ;;  %2323 = vmatprep.subr.bf16.mxu1 %v2598_v0 }
 0x59a   :  { %2301 = vmatpush1.bf16.msra.mxu0 %v2750_v4  ;;  %2325 = vmatpush3.bf16.msra.mxu1 %v2767_v17 }
 0x59b   :  { %2327 = vmatprep.subr.bf16.mxu0 %v2688_v5  ;;  %2358 = vmatprep.subr.bf16.mxu1 %v2598_v0 }
 0x650   :  { %v1044_v40 = vpop.f32.mrb[10].mxu0  ;;  %v1115_v42 = vpop.f32.mrb[10].mxu1 }
 0x651   :  { %v1119_v45 = vadd.f32 %v1044_v40, %v975_v39  ;;  %v1046_v47 = vpop.f32.mrb[11].mxu0  ;;  %v1863_v48 = vpop.f32.mrb[11].mxu1  ;;  %v1133_v5 = vadd.f32 %v2808_v37, %v1115_v42 }
 0x652   :  { %v1126_v51 = vadd.f32 %v1046_v47, %v976_v46 }
 0x653   :  { %v1512_v49 = vmul.f32 -1.442695, %v1119_v45  ;;  %v1315_v45 = vld [vmem:[#allocation3 + $0xb8] sm:$0xff] }
 0x654   :  { %v1513_v54 = vmul.f32 -1.442695, %v1126_v51 }
 0x655   :  { %2444 = vpow2.f32 %v1512_v49 }
 0x656   :  { %2446 = vpow2.f32 %v1513_v54 }
 0x65f   :  { %v2445_v55 = vpop.eup %2444 }
 0x660   :  { %v1123_v56 = vadd.f32 1.0, %v2445_v55  ;;  %v2447_v57 = vpop.eup %2446 }
 0x661   :  { %v1130_v58 = vadd.f32 1.0, %v2447_v57 }
 0x662   :  { %2448 = vrcp.f32 %v1123_v56 }
 0x663   :  { %2450 = vrcp.f32 %v1130_v58 }
 0x66c   :  { %v2449_v60 = vpop.eup %2448 }
 0x66d   :  { %v1134_v2 = vmul.f32 %v2449_v60, %v1133_v5  ;;  %v2451_v7 = vpop.eup %2450 }
 0x66e   :  { %v1137_v8 = vsub.f32 1.0, %v2451_v7  ;;  %v1139_v14 = vmul.f32 %v2451_v7, %v2980_v38 }
 0x66f   :  { %v1135_v3 = vadd.f32 %v1134_v2, %v977_v63 }
 0x671   :  { %2452 = vtanh.f32 %v1135_v3 }
 0x67b   :  { %v2453_v11 = vpop.eup %2452 }
 0x67c   :  { %v1138_v13 = vmul.f32 %v2453_v11, %v1137_v8 }
 0x67e   :  { %v3022_v18 = vadd.f32 %v1139_v14, %v1138_v13 }
 0x680   :  { %1142 = vst [vmem:[#allocation11 + $0x28] sm:$0xff] %v3022_v18  ;;  %1212 = vmatmul.mubr.f32.vlgmr.msra.gmra.mrb[12].mxu0 %v3022_v18  ;;  %1897 = vmatmul.mubr.f32.vlgmr.msra.gmra.mrb[12].mxu1 %v3022_v18 }
 0x681   :  { %2329 = vmatpush1.bf16.msra.mxu0 %v2690_v9  ;;  %2360 = vmatpush3.bf16.msra.mxu1 %v2707_v29 }
 0x682   :  { %2331 = vmatprep.subr.bf16.mxu0 %v2692_v10  ;;  %2361 = vmatprep.subr.bf16.mxu1 %v2598_v0 }
 0x683   :  { %1380 = vmatprep.mubr.f32.mxu0 %v2599_v1  ;;  %1931 = vmatprep.mubr.msk.f32.mxu1 %vm2600_vm0, %v2599_v1  ;;  %v1144_v1 = vld [vmem:[#allocation3 + $0x90] sm:$0xff] }
 0x685   :  { %2333 = vmatpush1.bf16.msra.mxu0 %v2696_v15  ;;  %2363 = vmatpush3.bf16.msra.mxu1 %v2713_v34 }
 0x686   :  { %2335 = vmatprep.subr.bf16.mxu0 %v2699_v16  ;;  %2364 = vmatprep.subr.bf16.mxu1 %v2598_v0  ;;  %v1145_v16 = vld [vmem:[#allocation3 + $0x98] sm:$0xff] }
 0x689   :  { %2337 = vmatpush1.bf16.msra.mxu0 %v2702_v21  ;;  %2366 = vmatpush3.bf16.msra.mxu1 %v2723_v43 }
 0x68a   :  { %2339 = vmatprep.subr.bf16.mxu0 %v2705_v23  ;;  %2367 = vmatprep.subr.bf16.mxu1 %v2598_v0 }
 0x68d   :  { %2341 = vmatpush1.bf16.msra.mxu0 %v2710_v32  ;;  %2369 = vmatpush3.bf16.msra.mxu1 %v2733_v52  ;;  %v1146_v52 = vld [vmem:[#allocation3 + $0xa0] sm:$0xff] }
 0x68e   :  { %2343 = vmatprep.subr.bf16.mxu0 %v2716_v35  ;;  %2370 = vmatprep.subr.bf16.mxu1 %v2598_v0 }
 0x691   :  { %2345 = vmatpush1.bf16.msra.mxu0 %v2720_v41  ;;  %2372 = vmatpush3.bf16.msra.mxu1 %v2743_v61 }
 0x692   :  { %2347 = vmatprep.subr.bf16.mxu0 %v2726_v44  ;;  %2373 = vmatprep.subr.bf16.mxu1 %v2598_v0 }
 0x695   :  { %2349 = vmatpush1.bf16.msra.mxu0 %v2730_v50  ;;  %2375 = vmatpush3.bf16.msra.mxu1 %v2753_v6 }
 0x696   :  { %2351 = vmatprep.subr.bf16.mxu0 %v2736_v53  ;;  %2376 = vmatprep.subr.bf16.mxu1 %v2598_v0 }
 0x699   :  { %2353 = vmatpush1.bf16.msra.mxu0 %v2740_v59  ;;  %2378 = vmatpush3.bf16.msra.mxu1 %v2761_v12 }
 0x69a   :  { %2355 = vmatprep.subr.bf16.mxu0 %v2746_v62  ;;  %2379 = vmatprep.subr.bf16.mxu1 %v2598_v0 }
 0x69d   :  { %2357 = vmatpush1.bf16.msra.mxu0 %v2750_v4  ;;  %2381 = vmatpush3.bf16.msra.mxu1 %v2767_v17 }
 0x753   :  { %v1213_v9 = vpop.f32.mrb[12].mxu0  ;;  %v1284_v10 = vpop.f32.mrb[12].mxu1 }
 0x754   :  { %v1288_v15 = vadd.f32 %v1213_v9, %v1144_v1  ;;  %v1215_v21 = vpop.f32.mrb[13].mxu0  ;;  %v1898_v23 = vpop.f32.mrb[13].mxu1  ;;  %v1302_v44 = vadd.f32 %v2808_v37, %v1284_v10 }
 0x755   :  { %v1295_v32 = vadd.f32 %v1215_v21, %v1145_v16 }
 0x756   :  { %v1514_v29 = vmul.f32 -1.442695, %v1288_v15 }
 0x757   :  { %v1515_v34 = vmul.f32 -1.442695, %v1295_v32 }
 0x758   :  { %2454 = vpow2.f32 %v1514_v29 }
 0x759   :  { %2456 = vpow2.f32 %v1515_v34 }
 0x762   :  { %v2455_v35 = vpop.eup %2454 }
 0x763   :  { %v1292_v41 = vadd.f32 1.0, %v2455_v35  ;;  %v2457_v0 = vpop.eup %2456 }
 0x764   :  { %v1299_v43 = vadd.f32 1.0, %v2457_v0 }
 0x765   :  { %2458 = vrcp.f32 %v1292_v41 }
 0x766   :  { %2460 = vrcp.f32 %v1299_v43 }
 0x76f   :  { %v2459_v50 = vpop.eup %2458 }
 0x770   :  { %v1303_v53 = vmul.f32 %v2459_v50, %v1302_v44  ;;  %v2461_v61 = vpop.eup %2460 }
 0x771   :  { %v1306_v62 = vsub.f32 1.0, %v2461_v61  ;;  %v1308_v12 = vmul.f32 %v2461_v61, %v3022_v18 }
 0x772   :  { %v1304_v59 = vadd.f32 %v1303_v53, %v1146_v52 }
 0x774   :  { %2462 = vtanh.f32 %v1304_v59 }
 0x77e   :  { %v2463_v4 = vpop.eup %2462 }
 0x77f   :  { %v1307_v6 = vmul.f32 %v2463_v4, %v1306_v62 }
 0x781   :  { %v1309_v17 = vadd.f32 %v1308_v12, %v1307_v6 }
 0x783   :  { %1311 = vst [vmem:[#allocation11 + $0x30] sm:$0xff] %v1309_v17  ;;  %1381 = vmatmul.mubr.f32.vlgmr.msra.gmra.mrb[14].mxu0 %v1309_v17  ;;  %1932 = vmatmul.mubr.f32.vlgmr.msra.gmra.mrb[14].mxu1 %v1309_v17 }
 0x856   :  { %v1382_v20 = vpop.f32.mrb[14].mxu0  ;;  %v1453_v22 = vpop.f32.mrb[14].mxu1 }
 0x857   :  { %v1457_v24 = vadd.f32 %v1382_v20, %v1313_v19  ;;  %v1384_v26 = vpop.f32.mrb[15].mxu0  ;;  %v1933_v27 = vpop.f32.mrb[15].mxu1  ;;  %v1471_v40 = vadd.f32 %v2808_v37, %v1453_v22 }
 0x858   :  { %v1464_v30 = vadd.f32 %v1384_v26, %v1314_v25 }
 0x859   :  { %v1516_v28 = vmul.f32 -1.442695, %v1457_v24 }
 0x85a   :  { %v1517_v31 = vmul.f32 -1.442695, %v1464_v30 }
 0x85b   :  { %2464 = vpow2.f32 %v1516_v28 }
 0x85c   :  { %2466 = vpow2.f32 %v1517_v31 }
 0x865   :  { %v2465_v33 = vpop.eup %2464 }
 0x866   :  { %v1461_v36 = vadd.f32 1.0, %v2465_v33  ;;  %v2467_v38 = vpop.eup %2466 }
 0x867   :  { %v1468_v39 = vadd.f32 1.0, %v2467_v38 }
 0x868   :  { %2468 = vrcp.f32 %v1461_v36 }
 0x869   :  { %2470 = vrcp.f32 %v1468_v39 }
 0x872   :  { %v2469_v42 = vpop.eup %2468 }
 0x873   :  { %v1472_v46 = vmul.f32 %v2469_v42, %v1471_v40  ;;  %v2471_v48 = vpop.eup %2470 }
 0x874   :  { %v1475_v49 = vsub.f32 1.0, %v2471_v48  ;;  %v1477_v55 = vmul.f32 %v2471_v48, %v1309_v17 }
 0x875   :  { %v1473_v47 = vadd.f32 %v1472_v46, %v1315_v45 }
 0x877   :  { %2472 = vtanh.f32 %v1473_v47 }
 0x881   :  { %v2473_v51 = vpop.eup %2472 }
 0x882   :  { %v1476_v54 = vmul.f32 %v2473_v51, %v1475_v49 }
 0x884   :  { %v1478_v56 = vadd.f32 %v1477_v55, %v1476_v54 }
 0x886   :  { %1480 = vst [vmem:[#allocation11 + $0x38] sm:$0xff] %v1478_v56 }
 0x887   :  { %2573 = shalt.err (!%p2570_p8)
}
 0x888   :  { %s2574_s14 = scalar_lea.hbm %s3079_s4, 1024 }
 0x889   :  { %p2575_p9 = scmp.ne.s32.totalorder %s3079_s4, %s2574_s14  ;;  %p2578_p10 = scmp.lt.u32.totalorder %s2574_s14, %s3079_s4 }
 0x88b   :  { %p2580_p11 = pnand %p2578_p10, %p2575_p9 }
 0x88d   :  { %2583 = shalt.err (!%p2580_p11)
}
 0x88e   :  { %s2602_s20 = smov 128   ;;  %s2603_s21 = smov 8  }
 0x88f   :  { %1493 = dma.vmem_to_hbm [thread:$0]  %s1488_s1, 1024, %s3079_s4, [#allocation5], %s2602_s20, %s2602_s20, %s2603_s21  }
 0x890   :  { %2590 = dma.done.wait [#allocation5], 1024  }
 0x891   :  { %2591 = vsyncadd [#allocation5], 4294966272 }
 0x892   :  { %1497 = vsyncpa [#allocation4], 1 }
 0x893   :  { %1498 = vsyncpa [#allocation7], 1 }
 0x894   :  { %1499 = vsyncpa [#allocation10], 1 }
 0x895   :  { %1500 = vsyncpa [#allocation5], 1 }

</bundles_post_ra>
